<compile_context>
chip_gen: v5e
topology: v5e:2x2
jax: 0.10.0
libtpu: 0.0.40
codegen_flags: <defaults>
</compile_context>

<pallas_src>
import functools

import jax
import jax.numpy as jnp
from jax.experimental import pallas as pl
from jax.experimental.pallas import tpu as pltpu

INF = 10000000000.0
BN_EPS = 1e-5


def _attention_bn_kernel(x_ref, mask_ref, mcol_ref, wqkv_ref, wo_ref,
                         gamma_ref, beta_ref, out_ref, *, batch, seq_len,
                         num_heads, head_dim):
    # x_ref     : (B*T, C)   flattened (batch, time) x channels input
    # mask_ref  : (B, T)     0/1 key mask
    # mcol_ref  : (B*T, 1)   0/1 row mask (query mask == BN pre/post mask)
    # wqkv_ref  : (C, 3C)    fused [Wq^T | Wk^T | Wv^T]
    # wo_ref    : (C, Cp)    Wo^T zero-padded to lane-dense Cp (multiple of 128)
    # gamma_ref : (1, Cp)    BatchNorm scale (zero-padded)
    # beta_ref  : (1, Cp)    BatchNorm shift (zero-padded)
    # out_ref   : (B*T, Cp)  final output (pre-mask -> BN -> post-mask)
    B, T, H, Dh = batch, seq_len, num_heads, head_dim
    C = H * Dh
    scale = 1.0 / (Dh ** 0.5)

    # ---- fused q/k/v projection: ONE (B*T, C) @ (C, 3C) MXU push ------------------
    qkv = jnp.dot(x_ref[...], wqkv_ref[...], preferred_element_type=jnp.float32)

    # ---- head split: single reshape/transpose per tensor (no per-head slices) -----
    def split_heads(base):
        t = qkv[:, base:base + C].reshape(B, T, H, Dh)
        return t.transpose(0, 2, 1, 3).reshape(B * H, T, Dh)     # index = b*H + h

    q_ = split_heads(0)
    k_ = split_heads(C)
    v_ = split_heads(2 * C)

    # ---- key mask built once, broadcast over the fused B*H batch axis -------------
    mask = mask_ref[...]                                          # (B, T) in {0,1}
    key_is_pad = jnp.broadcast_to(
        (mask == 0.0).reshape(B, 1, 1, T), (B, H, 1, T)).reshape(B * H, 1, T)

    # ---- batched scores / softmax / PV over all B*H heads at once -----------------
    s = jnp.einsum('bqd,bkd->bqk', q_, k_,
                   preferred_element_type=jnp.float32) * scale    # (B*H, T, T)
    s = jnp.where(key_is_pad, -INF, s)
    s_max = jnp.max(s, axis=-1, keepdims=True)
    e = jnp.exp(s - s_max)
    denom = jnp.sum(e, axis=-1, keepdims=True)
    p = e / denom            # exact normalization (approx reciprocal broke tolerance)
    # TODO(synk): dropout omitted (identity for keep_prob = 1.0 / eval mode)
    ctx = jnp.einsum('bqk,bkd->bqd', p, v_,
                     preferred_element_type=jnp.float32)          # (B*H, T, Dh)

    # ---- merge heads onto channels (pure reshape, no scratch), ONE o_net matmul ---
    ctx = ctx.reshape(B, H, T, Dh).transpose(0, 2, 1, 3).reshape(B * T, C)
    y = jnp.dot(ctx, wo_ref[...], preferred_element_type=jnp.float32)   # (B*T, Cp)

    # Query-mask * softmax == row-mask after the linear o_net, and the BatchNorm
    # pre-mask is the same row mask -> apply it once before the batch statistics.
    row_valid = mcol_ref[...] == 1.0                              # (B*T, 1)
    y = jnp.where(row_valid, y, 0.0)

    # ---- BatchNorm1d, training-mode batch stats over all B*T rows (biased var) ----
    inv_n = 1.0 / y.shape[0]
    mean = jnp.sum(y, axis=0, keepdims=True) * inv_n
    d = y - mean
    var = jnp.sum(d * d, axis=0, keepdims=True) * inv_n
    yn = d * jax.lax.rsqrt(var + BN_EPS)
    yn = yn * gamma_ref[...] + beta_ref[...]

    # BN post-mask (is_mask=True); lane-dense (B*T, 128) unmasked stores.
    out_ref[...] = jnp.where(row_valid, yn, 0.0)


def attention_forward(seq_bct, mask, params, num_heads):
    """seq_bct: (B, C, T) float32 (PyTorch NCL layout); mask: (B, T) in {0,1}."""
    B, C, T = seq_bct.shape
    H = num_heads
    Dh = C // H
    Cp = ((C + 127) // 128) * 128          # lane-dense padded output width (here 128)

    # ---- layout plumbing done in the wrapper (free XLA work) -----------------------
    x_flat = jnp.transpose(seq_bct, (0, 2, 1)).reshape(B * T, C).astype(jnp.float32)
    m = mask.astype(jnp.float32)                     # (B, T)  key mask
    mask_col = m.reshape(B * T, 1)                   # query / BN-pre / BN-post mask

    w_qkv = jnp.concatenate(
        [params["wq"].T, params["wk"].T, params["wv"].T], axis=1).astype(jnp.float32)
    wo_pad = jnp.zeros((C, Cp), jnp.float32).at[:, :C].set(params["wo"].T)
    gamma_pad = jnp.zeros((1, Cp), jnp.float32).at[:, :C].set(params["gamma"])
    beta_pad = jnp.zeros((1, Cp), jnp.float32).at[:, :C].set(params["beta"])

    kernel = functools.partial(_attention_bn_kernel, batch=B, seq_len=T,
                               num_heads=H, head_dim=Dh)
    vmem = lambda: pl.BlockSpec(memory_space=pltpu.MemorySpace.VMEM)
    out = pl.pallas_call(
        kernel,
        out_shape=jax.ShapeDtypeStruct((B * T, Cp), jnp.float32),
        in_specs=[vmem() for _ in range(7)],
        out_specs=vmem(),
    )(x_flat, m, mask_col, w_qkv, wo_pad, gamma_pad, beta_pad)

    return jnp.transpose(out[:, :C].reshape(B, T, C), (0, 2, 1))   # (B, C, T)


def ref_forward(seq_bct, mask, params, H):
    """Pure-JAX mirror of the PyTorch forward (eval dropout, train-mode BN stats)."""
    B, C, T = seq_bct.shape
    Dh = C // H
    x = jnp.transpose(seq_bct, (0, 2, 1))
    Q = x @ params["wq"].T
    K = x @ params["wk"].T
    V = x @ params["wv"].T
    Q_ = jnp.concatenate(jnp.split(Q, H, axis=2), axis=0)
    K_ = jnp.concatenate(jnp.split(K, H, axis=2), axis=0)
    V_ = jnp.concatenate(jnp.split(V, H, axis=2), axis=0)
    out = jnp.einsum('bqd,bkd->bqk', Q_, K_) / (Dh ** 0.5)
    key_masks = jnp.tile(mask, (H, 1))[:, None, :]
    out = jnp.where(key_masks == 0, -INF, out)
    query_masks = jnp.tile(mask, (H, 1))[:, :, None].astype(jnp.float32)
    att = jax.nn.softmax(out, axis=-1) * query_masks
    xo = jnp.einsum('bqk,bkd->bqd', att, V_)
    xo = jnp.concatenate(jnp.split(xo, H, axis=0), axis=2)
    xo = xo @ params["wo"].T
    xT = jnp.transpose(xo, (0, 2, 1))                     # (B, C, T)
    mm = mask[:, None, :]
    xT = jnp.where(mm == 1, xT, 0.0)
    mean = jnp.mean(xT, axis=(0, 2), keepdims=True)
    var = jnp.mean((xT - mean) ** 2, axis=(0, 2), keepdims=True)
    y = (xT - mean) / jnp.sqrt(var + BN_EPS)
    y = y * params["gamma"][None, :, None] + params["beta"][None, :, None]
    y = jnp.where(mm == 1, y, 0.0)
    return y


if __name__ == "__main__":
    B, C, T, H = 2, 32, 8, 4   # num_units=32, num_heads=4, seq_len=8

    key = jax.random.PRNGKey(0)
    k0, k1, k2, k3, k4 = jax.random.split(key, 5)

    seq = jax.random.normal(k0, (B, C, T), dtype=jnp.float32)
    lengths = jnp.array([T, 5])
    mask = (jnp.arange(T)[None, :] < lengths[:, None]).astype(jnp.float32)   # (B, T)

    scale = 1.0 / (C ** 0.5)
    params = {
        "wq": jax.random.normal(k1, (C, C), jnp.float32) * scale,
        "wk": jax.random.normal(k2, (C, C), jnp.float32) * scale,
        "wv": jax.random.normal(k3, (C, C), jnp.float32) * scale,
        "wo": jax.random.normal(k4, (C, C), jnp.float32) * scale,
        "gamma": jnp.ones((C,), jnp.float32),   # BatchNorm affine defaults
        "beta": jnp.zeros((C,), jnp.float32),
    }

    out = attention_forward(seq, mask, params, H)
    out = jax.block_until_ready(out)

    ref = ref_forward(seq, mask, params, H)
    err = float(jnp.max(jnp.abs(out - ref)))
    assert out.shape == (B, C, T), out.shape
    # Exact softmax normalization + f32 everywhere -> error should be ~1e-5.
    assert err < 2e-3, f"max abs error {err}"

    print("KERNEL_OK")
</pallas_src>

<mosaic_0001>
module attributes {stable_mosaic.version = 11 : i64} {
  func.func @_attention_bn_kernel(%arg0: memref<16x32xf32, #tpu.memory_space<vmem>>, %arg1: memref<2x8xf32, #tpu.memory_space<vmem>>, %arg2: memref<16x1xf32, #tpu.memory_space<vmem>>, %arg3: memref<32x96xf32, #tpu.memory_space<vmem>>, %arg4: memref<32x128xf32, #tpu.memory_space<vmem>>, %arg5: memref<1x128xf32, #tpu.memory_space<vmem>>, %arg6: memref<1x128xf32, #tpu.memory_space<vmem>>, %arg7: memref<16x128xf32, #tpu.memory_space<vmem>>) attributes {dimension_semantics = [], scalar_prefetch = 0 : i64, scratch_operands = 0 : i64, tpu.core_type = #tpu.core_type<tc>} {
    %c0 = arith.constant 0 : index
    %c0_0 = arith.constant 0 : index
    %0 = vector.load %arg0[%c0, %c0_0] : memref<16x32xf32, #tpu.memory_space<vmem>>, vector<16x32xf32>
    %c0_1 = arith.constant 0 : index
    %c0_2 = arith.constant 0 : index
    %1 = vector.load %arg3[%c0_1, %c0_2] : memref<32x96xf32, #tpu.memory_space<vmem>>, vector<32x96xf32>
    %cst = arith.constant dense<0.000000e+00> : vector<16x96xf32>
    %2 = tpu.matmul %0, %1, %cst {dimension_numbers = #tpu.dot_dimension_numbers<[1], [0], [0], [1], [0, 0, 1, 1], [], []>} : vector<16x32xf32>, vector<32x96xf32>, vector<16x96xf32> -> vector<16x96xf32>
    %3 = vector.extract_strided_slice %2 {offsets = [0, 0], sizes = [16, 32], strides = [1, 1]} : vector<16x96xf32> to vector<16x32xf32>
    %4 = vector.shape_cast %3 : vector<16x32xf32> to vector<2x8x4x8xf32>
    %5 = tpu.transpose %4, [0, 2, 1, 3] : vector<2x8x4x8xf32> -> vector<2x4x8x8xf32>
    %6 = vector.shape_cast %5 : vector<2x4x8x8xf32> to vector<8x8x8xf32>
    %7 = vector.extract_strided_slice %2 {offsets = [0, 32], sizes = [16, 32], strides = [1, 1]} : vector<16x96xf32> to vector<16x32xf32>
    %8 = vector.shape_cast %7 : vector<16x32xf32> to vector<2x8x4x8xf32>
    %9 = tpu.transpose %8, [0, 2, 1, 3] : vector<2x8x4x8xf32> -> vector<2x4x8x8xf32>
    %10 = vector.shape_cast %9 : vector<2x4x8x8xf32> to vector<8x8x8xf32>
    %11 = vector.extract_strided_slice %2 {offsets = [0, 64], sizes = [16, 32], strides = [1, 1]} : vector<16x96xf32> to vector<16x32xf32>
    %12 = vector.shape_cast %11 : vector<16x32xf32> to vector<2x8x4x8xf32>
    %13 = tpu.transpose %12, [0, 2, 1, 3] : vector<2x8x4x8xf32> -> vector<2x4x8x8xf32>
    %14 = vector.shape_cast %13 : vector<2x4x8x8xf32> to vector<8x8x8xf32>
    %c0_3 = arith.constant 0 : index
    %c0_4 = arith.constant 0 : index
    %15 = vector.load %arg1[%c0_3, %c0_4] : memref<2x8xf32, #tpu.memory_space<vmem>>, vector<2x8xf32>
    %cst_5 = arith.constant 0.000000e+00 : f32
    %16 = vector.broadcast %cst_5 : f32 to vector<2x8xf32>
    %17 = arith.cmpf oeq, %15, %16 : vector<2x8xf32>
    %18 = vector.shape_cast %17 : vector<2x8xi1> to vector<2x1x1x8xi1>
    %19 = vector.shape_cast %18 : vector<2x1x1x8xi1> to vector<2x1x1x8xi1>
    %20 = vector.broadcast %19 : vector<2x1x1x8xi1> to vector<2x4x1x8xi1>
    %21 = vector.shape_cast %20 : vector<2x4x1x8xi1> to vector<8x1x8xi1>
    "tpu.trace_start"() <{level = 10 : i32, message = "bqd,bkd->bqk"}> : () -> ()
    %cst_6 = arith.constant dense<0.000000e+00> : vector<8x8x8xf32>
    %22 = tpu.matmul %6, %10, %cst_6 {dimension_numbers = #tpu.dot_dimension_numbers<[2], [2], [1], [1], [0, 0, 0, 1, 1, 1], [0], [0]>} : vector<8x8x8xf32>, vector<8x8x8xf32>, vector<8x8x8xf32> -> vector<8x8x8xf32>
    "tpu.trace_stop"() : () -> ()
    %cst_7 = arith.constant 0.353553385 : f32
    %23 = vector.broadcast %cst_7 : f32 to vector<8x8x8xf32>
    %24 = arith.mulf %22, %23 : vector<8x8x8xf32>
    %cst_8 = arith.constant -1.000000e+10 : f32
    %25 = vector.shape_cast %21 : vector<8x1x8xi1> to vector<8x1x8xi1>
    %26 = vector.broadcast %25 : vector<8x1x8xi1> to vector<8x8x8xi1>
    %27 = vector.broadcast %cst_8 : f32 to vector<8x8x8xf32>
    %28 = arith.select %26, %27, %24 : vector<8x8x8xi1>, vector<8x8x8xf32>
    %cst_9 = arith.constant dense<0xFF800000> : vector<8x8xf32>
    %29 = vector.multi_reduction <maximumf>, %28, %cst_9 [2] : vector<8x8x8xf32> to vector<8x8xf32>
    %30 = vector.shape_cast %29 : vector<8x8xf32> to vector<8x8x1xf32>
    %31 = vector.broadcast %30 : vector<8x8x1xf32> to vector<8x8x8xf32>
    %32 = arith.subf %28, %31 : vector<8x8x8xf32>
    %33 = math.exp %32 : vector<8x8x8xf32>
    %cst_10 = arith.constant dense<0.000000e+00> : vector<8x8xf32>
    %34 = vector.multi_reduction <add>, %33, %cst_10 [2] : vector<8x8x8xf32> to vector<8x8xf32>
    %35 = vector.shape_cast %34 : vector<8x8xf32> to vector<8x8x1xf32>
    %36 = vector.broadcast %35 : vector<8x8x1xf32> to vector<8x8x8xf32>
    %37 = arith.divf %33, %36 : vector<8x8x8xf32>
    "tpu.trace_start"() <{level = 10 : i32, message = "bqk,bkd->bqd"}> : () -> ()
    %cst_11 = arith.constant dense<0.000000e+00> : vector<8x8x8xf32>
    %38 = tpu.matmul %37, %14, %cst_11 {dimension_numbers = #tpu.dot_dimension_numbers<[2], [1], [1], [2], [0, 0, 0, 1, 1, 2], [0], [0]>} : vector<8x8x8xf32>, vector<8x8x8xf32>, vector<8x8x8xf32> -> vector<8x8x8xf32>
    "tpu.trace_stop"() : () -> ()
    %39 = vector.shape_cast %38 : vector<8x8x8xf32> to vector<2x4x8x8xf32>
    %40 = tpu.transpose %39, [0, 2, 1, 3] : vector<2x4x8x8xf32> -> vector<2x8x4x8xf32>
    %41 = vector.shape_cast %40 : vector<2x8x4x8xf32> to vector<16x32xf32>
    %c0_12 = arith.constant 0 : index
    %c0_13 = arith.constant 0 : index
    %42 = vector.load %arg4[%c0_12, %c0_13] : memref<32x128xf32, #tpu.memory_space<vmem>>, vector<32x128xf32>
    %cst_14 = arith.constant dense<0.000000e+00> : vector<16x128xf32>
    %43 = tpu.matmul %41, %42, %cst_14 {dimension_numbers = #tpu.dot_dimension_numbers<[1], [0], [0], [1], [0, 0, 1, 1], [], []>} : vector<16x32xf32>, vector<32x128xf32>, vector<16x128xf32> -> vector<16x128xf32>
    %c0_15 = arith.constant 0 : index
    %c0_16 = arith.constant 0 : index
    %44 = vector.load %arg2[%c0_15, %c0_16] : memref<16x1xf32, #tpu.memory_space<vmem>>, vector<16x1xf32>
    %cst_17 = arith.constant 1.000000e+00 : f32
    %45 = vector.broadcast %cst_17 : f32 to vector<16x1xf32>
    %46 = arith.cmpf oeq, %44, %45 : vector<16x1xf32>
    %cst_18 = arith.constant 0.000000e+00 : f32
    %47 = vector.shape_cast %46 : vector<16x1xi1> to vector<16x1xi1>
    %48 = vector.broadcast %47 : vector<16x1xi1> to vector<16x128xi1>
    %49 = vector.broadcast %cst_18 : f32 to vector<16x128xf32>
    %50 = arith.select %48, %43, %49 : vector<16x128xi1>, vector<16x128xf32>
    %cst_19 = arith.constant dense<0.000000e+00> : vector<128xf32>
    %51 = vector.multi_reduction <add>, %50, %cst_19 [0] : vector<16x128xf32> to vector<128xf32>
    %52 = vector.shape_cast %51 : vector<128xf32> to vector<1x128xf32>
    %cst_20 = arith.constant 6.250000e-02 : f32
    %53 = vector.broadcast %cst_20 : f32 to vector<1x128xf32>
    %54 = arith.mulf %52, %53 : vector<1x128xf32>
    %55 = vector.broadcast %54 : vector<1x128xf32> to vector<16x128xf32>
    %56 = arith.subf %50, %55 : vector<16x128xf32>
    %57 = arith.mulf %56, %56 : vector<16x128xf32>
    %cst_21 = arith.constant dense<0.000000e+00> : vector<128xf32>
    %58 = vector.multi_reduction <add>, %57, %cst_21 [0] : vector<16x128xf32> to vector<128xf32>
    %59 = vector.shape_cast %58 : vector<128xf32> to vector<1x128xf32>
    %cst_22 = arith.constant 6.250000e-02 : f32
    %60 = vector.broadcast %cst_22 : f32 to vector<1x128xf32>
    %61 = arith.mulf %59, %60 : vector<1x128xf32>
    %cst_23 = arith.constant 9.99999974E-6 : f32
    %62 = vector.broadcast %cst_23 : f32 to vector<1x128xf32>
    %63 = arith.addf %61, %62 : vector<1x128xf32>
    %64 = math.rsqrt %63 : vector<1x128xf32>
    %65 = vector.broadcast %64 : vector<1x128xf32> to vector<16x128xf32>
    %66 = arith.mulf %56, %65 : vector<16x128xf32>
    %c0_24 = arith.constant 0 : index
    %c0_25 = arith.constant 0 : index
    %67 = vector.load %arg5[%c0_24, %c0_25] : memref<1x128xf32, #tpu.memory_space<vmem>>, vector<1x128xf32>
    %68 = vector.broadcast %67 : vector<1x128xf32> to vector<16x128xf32>
    %69 = arith.mulf %66, %68 : vector<16x128xf32>
    %c0_26 = arith.constant 0 : index
    %c0_27 = arith.constant 0 : index
    %70 = vector.load %arg6[%c0_26, %c0_27] : memref<1x128xf32, #tpu.memory_space<vmem>>, vector<1x128xf32>
    %71 = vector.broadcast %70 : vector<1x128xf32> to vector<16x128xf32>
    %72 = arith.addf %69, %71 : vector<16x128xf32>
    %cst_28 = arith.constant 0.000000e+00 : f32
    %73 = vector.shape_cast %46 : vector<16x1xi1> to vector<16x1xi1>
    %74 = vector.broadcast %73 : vector<16x1xi1> to vector<16x128xi1>
    %75 = vector.broadcast %cst_28 : f32 to vector<16x128xf32>
    %76 = arith.select %74, %72, %75 : vector<16x128xi1>, vector<16x128xf32>
    %c0_29 = arith.constant 0 : index
    %c0_30 = arith.constant 0 : index
    %77 = vector.load %arg7[%c0_29, %c0_30] : memref<16x128xf32, #tpu.memory_space<vmem>>, vector<16x128xf32>
    tpu.vector_store %arg7[%c0_29, %c0_30], %76 {strides = array<i32>} : memref<16x128xf32, #tpu.memory_space<vmem>>, vector<16x128xf32>,
    return
  }
}

</mosaic_0001>

<bundles_post_ra>
// kernel: tpu_custom_call.1
= control target key start
LH: loop header
LB: loop body
LE: loop exit
PB: predicated region body
PF: predicated region fallthrough
CT: control target
= control target key end

     0   :  { %12 = vsyncpa [#allocation3], 0  ;;  %s2680_s0 = inlined_call_operand.vmem [shape: f32[16,32], index: 0, kind: input, shape index: {}]   ;;  %s2681_s1 = inlined_call_operand.hbm [shape: f32[2,8], index: 1, kind: input, shape index: {}]   ;;  %s2682_s2 = inlined_call_operand.vmem [shape: f32[16,1], index: 2, kind: input, shape index: {}]   ;;  %s2683_s3 = inlined_call_operand.hbm [shape: f32[32,96], index: 3, kind: input, shape index: {}]   ;;  %s2684_s4 = inlined_call_operand.hbm [shape: f32[32,128], index: 4, kind: input, shape index: {}]   ;;  %s2685_s5 = inlined_call_operand.vmem [shape: f32[1,128], index: 5, kind: input, shape index: {}]   ;;  %s2686_s6 = inlined_call_operand.vmem [shape: f32[1,128], index: 6, kind: input, shape index: {}]   ;;  %s2687_s7 = inlined_call_operand.hbm [shape: f32[16,128], index: 7, kind: output, shape index: {}]  }
   0x1   :  { %13 = vsyncpa [#allocation6], 0  ;;  %s34_s26 = sshll.u32 %s2683_s3, 4  ;;  %s35_s26 = int_to_ptr.hbm [resolvable:$true] %s34_s26 }
   0x2   :  { %14 = vsyncpa [#allocation4], 0  ;;  %s2026_s27 = smov [#allocation5]   ;;  %s22_s8 = sshll.u32 %s2681_s1, 4  ;;  %s23_s8 = int_to_ptr.hbm [resolvable:$true] %s22_s8 }
   0x3   :  { %s36_s28 = sshll.u32 %s2026_s27, 4  ;;  %s2027_s9 = smov 128   ;;  %s37_s28 = int_to_ptr.vmem [resolvable:$true] %s36_s28 }
   0x4   :  { %s2028_s10 = smov 8   ;;  %s2029_s11 = smov [#allocation2]  }
   0x5   :  { %42 = dma.hbm_to_vmem [thread:$0]  %s35_s26, 512, %s37_s28, [#allocation6], %s2027_s9, %s2027_s9, %s2028_s10  }
   0x6   :  { %s24_s12 = sshll.u32 %s2029_s11, 4  ;;  %s47_s14 = sshll.u32 %s2684_s4, 4  ;;  %s25_s12 = int_to_ptr.vmem [resolvable:$true] %s24_s12  ;;  %s48_s14 = int_to_ptr.hbm [resolvable:$true] %s47_s14 }
   0x7   :  { %27 = dma.hbm_to_vmem [thread:$0]  %s23_s8, 32, %s25_s12, [#allocation3]  }
   0x8   :  { %s2030_s15 = smov [#allocation7]  }
   0x9   :  { %s49_s16 = sshll.u32 %s2030_s15, 4  ;;  %s50_s16 = int_to_ptr.vmem [resolvable:$true] %s49_s16 }
   0xa   :  { %55 = dma.hbm_to_vmem [thread:$0]  %s48_s14, 512, %s50_s16, [#allocation6], %s2027_s9, %s2027_s9, %s2028_s10  }
   0xb   :  { %2020 = dma.done.wait [#allocation3], 32  }
   0xc   :  { %2021 = vsyncadd [#allocation3], 4294967264 }
   0xd   :  { %2022 = dma.done.wait [#allocation6], 1024  }
   0xe   :  { %2023 = vsyncadd [#allocation6], 4294966272  ;;  %v77_v0 = vld [vmem:[#allocation5 + $0x18] sm:$0xff]  ;;  %v76_v1 = vld [vmem:[#allocation5 + $0x10] sm:$0xff]  ;;  %vm78_vm0 = vcmask 261120   ;;  %s2031_s19 = smov 120  }
   0xf   :  { %97 = vmatpush.msra.mxu0 %v77_v0  ;;  %v75_v2 = vld [vmem:[#allocation5 + $0x8] sm:$0xff]  ;;  %v74_v3 = vld [vmem:[#allocation5] sm:$0xff]  ;;  %s2032_s20 = smov 112   ;;  %s2033_s21 = smov 104   ;;  %v2035_v10 = vmov 1983009808  }
  0x10   :  { %v72_v4 = vld [vmem:[%s2680_s0] sm:$0xff]  ;;  %v73_v5 = vld [vmem:[%s2680_s0 + $0x8] sm:$0xff]  ;;  %s2034_s0 = smov 96   ;;  %v134_v11 = vunpack.c.l.s4 %v2035_v10  ;;  %vm129_vm1 = vcmask 1047556   ;;  %v2036_v24 = vmov 1934713408  }
  0x11   :  { %98 = vmatpush.msra.mxu0 %v76_v1  ;;  %v158_v25 = vunpack.c.l.s4 %v2036_v24  ;;  %s2037_s22 = smov 64   ;;  %vm845_vm2 = vcmask 64512   ;;  %s2039_s23 = smov 16  }
  0x12   :  { %v2131_v16 = vunpack.c.0.s8 %v134_v11  ;;  %s2040_s24 = smov 24   ;;  %s2041_s11 = smov [#allocation8]  }
  0x13   :  { %99 = vmatpush.msra.mxu0 %v75_v2  ;;  %v2153_v33 = vunpack.c.0.s8 %v158_v25  ;;  %s1806_s12 = sshll.u32 %s2041_s11, 4  ;;  %s1808_s14 = sshll.u32 %s2687_s7, 4  ;;  %s1807_s12 = int_to_ptr.vmem [resolvable:$true] %s1806_s12  ;;  %s1809_s14 = int_to_ptr.hbm [resolvable:$true] %s1808_s14 }
  0x15   :  { %100 = vmatpush.msra.mxu0 %v74_v3 }
  0x16   :  { %1822 = vmatmul.msk.f32.vlgmr.msra.gmra.mxu0 %vm78_vm0, %v72_v4 }
  0x1e   :  { %1823 = vmatmul.msk.f32.gmra.mxu0 %vm78_vm0, %v73_v5 }
  0x93   :  { %v2105_v6 = vpop.f32.mrf.mxu0 }
  0x94   :  { %110 = vrot.lane.b32.xlu1 %v2105_v6, %s2031_s19  ;;  %116 = vrot.lane.b32.xlu0 %v2105_v6, %s2032_s20  ;;  %v131_v18 = vrot.slane %v2105_v6, 4 }
  0x9b   :  { %v2109_v7 = vpop.f32.mrf.mxu0 }
  0x9c   :  { %122 = vrot.lane.b32.xlu0 %v2105_v6, %s2033_s21  ;;  %118 = vrot.lane.b32.xlu2 %v2109_v7, %s2032_s20  ;;  %v187_v13 = vrot.slane %v2109_v7, 4 }
  0x9d   :  { %112 = vrot.lane.b32.xlu1 %v2109_v7, %s2031_s19 }
  0xa4   :  { %124 = vrot.lane.b32.xlu2 %v2109_v7, %s2033_s21 }
  0xa5   :  { %349 = vrot.lane.b32.xlu1 %v2105_v6, %s2034_s0 }
  0xad   :  { %351 = vrot.lane.b32.xlu1 %v2109_v7, %s2034_s0 }
  0xf6   :  { %v2119_v8 = vpop.permute.xlu2 %118 }
  0xf7   :  { %v185_v12 = vrot.slane %v2119_v8, 4  ;;  %v188_v19 = vsel %vm129_vm1, %v2119_v8, %v187_v13 }
  0xf8   :  { %v196_v23 = vperm.slane %v188_v19, %v2131_v16 }
  0xf9   :  { %v186_v21 = vsel %vm129_vm1, %v185_v12, %v2109_v7 }
  0xfa   :  { %v192_v28 = vperm.slane %v186_v21, %v2131_v16  ;;  %v223_v32 = vrot.slane %v196_v23, 4 }
  0xfc   :  { %v211_v41 = vrot.slane %v192_v28, 4 }
  0xfe   :  { %v2121_v9 = vpop.permute.xlu2 %124 }
  0xff   :  { %363 = vrot.lane.b32.xlu1 %v2121_v9, %s2034_s0  ;;  %v197_v27 = vrot.slane %v2121_v9, 4 }
 0x106   :  { %v2127_v14 = vpop.permute.xlu1 %110  ;;  %v2129_v15 = vpop.permute.xlu0 %116 }
 0x107   :  { %v128_v17 = vrot.slane %v2129_v15, 4  ;;  %357 = vrot.lane.b32.xlu0 %v2129_v15, %s2034_s0  ;;  %v132_v20 = vsel %vm129_vm1, %v2129_v15, %v131_v18  ;;  %v143_v29 = vrot.slane %v2127_v14, 4 }
 0x108   :  { %v140_v26 = vperm.slane %v132_v20, %v2131_v16 }
 0x109   :  { %v130_v22 = vsel %vm129_vm1, %v128_v17, %v2105_v6 }
 0x10a   :  { %v136_v30 = vperm.slane %v130_v22, %v2131_v16  ;;  %v167_v37 = vrot.slane %v140_v26, 4  ;;  %v1866_v22 = vpack.i.bf16 %v2127_v14, %v2105_v6 }
 0x10c   :  { %v155_v42 = vrot.slane %v136_v30, 4 }
 0x10e   :  { %v2151_v31 = vpop.permute.xlu0 %122 }
 0x10f   :  { %v141_v34 = vrot.slane %v2151_v31, 4  ;;  %v144_v35 = vsel %vm129_vm1, %v2151_v31, %v143_v29  ;;  %v2158_v36 = vpop.permute.xlu1 %112  ;;  %353 = vrot.lane.b32.xlu0 %v2127_v14, %s2034_s0  ;;  %361 = vrot.lane.b32.xlu2 %v2151_v31, %s2034_s0 }
 0x110   :  { %v152_v38 = vperm.slane %v144_v35, %v2131_v16  ;;  %v198_v39 = vsel %vm129_vm1, %v197_v27, %v2158_v36  ;;  %v199_v40 = vrot.slane %v2158_v36, 4 }
 0x111   :  { %v142_v43 = vsel %vm129_vm1, %v141_v34, %v2127_v14  ;;  %v204_v44 = vperm.slane %v198_v39, %v2131_v16 }
 0x112   :  { %v148_v45 = vperm.slane %v142_v43, %v2131_v16  ;;  %v165_v46 = vrot.slane %v152_v38, 4  ;;  %v168_v47 = vsel %vm129_vm1, %v152_v38, %v167_v37  ;;  %v200_v48 = vsel %vm129_vm1, %v2121_v9, %v199_v40 }
 0x113   :  { %v176_v49 = vperm.slane %v168_v47, %v2153_v33  ;;  %v208_v50 = vperm.slane %v200_v48, %v2131_v16  ;;  %v209_v51 = vrot.slane %v204_v44, 4  ;;  %v212_v52 = vsel %vm129_vm1, %v204_v44, %v211_v41 }
 0x114   :  { %v153_v53 = vrot.slane %v148_v45, 4  ;;  %v156_v54 = vsel %vm129_vm1, %v148_v45, %v155_v42  ;;  %v166_v55 = vsel %vm129_vm1, %v165_v46, %v140_v26  ;;  %v220_v56 = vperm.slane %v212_v52, %v2153_v33 }
 0x115   :  { %v164_v57 = vperm.slane %v156_v54, %v2153_v33  ;;  %v172_v58 = vperm.slane %v166_v55, %v2153_v33  ;;  %v183_v59 = vrot.slane %v176_v49, 4  ;;  %v210_v60 = vsel %vm129_vm1, %v209_v51, %v192_v28 }
 0x116   :  { %v154_v61 = vsel %vm129_vm1, %v153_v53, %v136_v30  ;;  %v216_v62 = vperm.slane %v210_v60, %v2153_v33  ;;  %v221_v63 = vrot.slane %v208_v50, 4  ;;  %v224_v0 = vsel %vm129_vm1, %v208_v50, %v223_v32 }
 0x117   :  { %v160_v1 = vperm.slane %v154_v61, %v2153_v33  ;;  %v179_v2 = vrot.slane %v164_v57, 4  ;;  %v181_v3 = vrot.slane %v172_v58, 4  ;;  %v184_v4 = vsel %vm129_vm1, 0.0, %v183_v59  ;;  %359 = vrot.lane.b32.xlu0 %v2119_v8, %s2034_s0  ;;  %355 = vrot.lane.b32.xlu2 %v2158_v36, %s2034_s0 }
 0x118   :  { %v222_v5 = vsel %vm129_vm1, %v221_v63, %v196_v23  ;;  %v232_v10 = vperm.slane %v224_v0, %v2153_v33  ;;  %v233_v11 = vrot.slane %v216_v62, 4  ;;  %v235_v18 = vrot.slane %v220_v56, 4 }
 0x119   :  { %v177_v12 = vrot.slane %v160_v1, 4  ;;  %v180_v13 = vsel %vm129_vm1, 0.0, %v179_v2  ;;  %v228_v17 = vperm.slane %v222_v5, %v2153_v33  ;;  %v257_v20 = vrot.slane %v184_v4, 4 }
 0x11a   :  { %v246_v19 = vrot.slane %v180_v13, 4  ;;  %v239_v21 = vrot.slane %v232_v10, 4  ;;  %v236_v24 = vsel %vm129_vm1, 0.0, %v235_v18  ;;  %v182_v26 = vsel %vm129_vm1, 0.0, %v181_v3 }
 0x11b   :  { %v237_v25 = vrot.slane %v228_v17, 4  ;;  %v178_v23 = vsel %vm129_vm1, 0.0, %v177_v12  ;;  %v300_v28 = vrot.slane %v236_v24, 4  ;;  %v241_v29 = vsel %vm129_vm1, %v179_v2, %v160_v1 }
 0x11c   :  { %v240_v27 = vsel %vm129_vm1, 0.0, %v239_v21  ;;  %v247_v30 = vsel %vm129_vm1, %v246_v19, %v178_v23  ;;  %v234_v32 = vsel %vm129_vm1, 0.0, %v233_v11  ;;  %v245_v34 = vperm.slane %v241_v29, %v2131_v16 }
 0x11d   :  { %v251_v6 = vperm.slane %v247_v30, %v2131_v16  ;;  %v252_v14 = vsel %vm129_vm1, %v183_v59, %v172_v58  ;;  %v311_v35 = vrot.slane %v240_v27, 4  ;;  %v258_v38 = vsel %vm129_vm1, %v257_v20, %v182_v26 }
 0x11e   :  { %v256_v37 = vperm.slane %v252_v14, %v2131_v16  ;;  %v295_v39 = vsel %vm129_vm1, %v235_v18, %v216_v62  ;;  %v262_v40 = vperm.slane %v258_v38, %v2131_v16  ;;  %v265_v42 = vrot.slane %v245_v34, 4 }
 0x11f   :  { %1867 = vrot.lane.b32.xlu0 %v1866_v22, %s2037_s22  ;;  %v263_v41 = vrot.slane %v251_v6, 4  ;;  %v238_v43 = vsel %vm129_vm1, 0.0, %v237_v25  ;;  %v299_v45 = vperm.slane %v295_v39, %v2131_v16  ;;  %v301_v46 = vsel %vm129_vm1, %v300_v28, %v234_v32 }
 0x120   :  { %v277_v44 = vrot.slane %v256_v37, 4  ;;  %v306_v47 = vsel %vm129_vm1, %v239_v21, %v228_v17  ;;  %v275_v49 = vrot.slane %v262_v40, 4  ;;  %v266_v50 = vsel %vm129_vm1, %v251_v6, %v265_v42 }
 0x121   :  { %v264_v48 = vsel %vm129_vm1, %v263_v41, %v245_v34  ;;  %v305_v51 = vperm.slane %v301_v46, %v2131_v16  ;;  %v274_v53 = vperm.slane %v266_v50, %v2153_v33  ;;  %v310_v55 = vperm.slane %v306_v47, %v2131_v16  ;;  %v350_v34 = vpop.permute.xlu1 %349 }
 0x122   :  { %v270_v52 = vperm.slane %v264_v48, %v2153_v33  ;;  %v278_v54 = vsel %vm129_vm1, %v262_v40, %v277_v44  ;;  %v276_v56 = vsel %vm129_vm1, %v275_v49, %v256_v37  ;;  %v312_v58 = vsel %vm129_vm1, %v311_v35, %v238_v43 }
 0x123   :  { %v286_v57 = vperm.slane %v278_v54, %v2153_v33  ;;  %v317_v59 = vrot.slane %v305_v51, 4  ;;  %v282_v60 = vperm.slane %v276_v56, %v2153_v33  ;;  %v293_v62 = vrot.slane %v274_v53, 4 }
 0x124   :  { %v289_v61 = vrot.slane %v270_v52, 4  ;;  %v316_v63 = vperm.slane %v312_v58, %v2131_v16  ;;  %v319_v2 = vrot.slane %v299_v45, 4  ;;  %v331_v3 = vrot.slane %v310_v55, 4 }
 0x125   :  { %v291_v0 = vrot.slane %v286_v57, 4  ;;  %v318_v1 = vsel %vm129_vm1, %v317_v59, %v299_v45  ;;  %v287_v5 = vrot.slane %v282_v60, 4  ;;  %v2235_v10 = vsel %vm129_vm1, %v286_v57, %v293_v62 }
 0x126   :  { %v2232_v4 = vsel %vm129_vm1, %v282_v60, %v289_v61  ;;  %v324_v11 = vperm.slane %v318_v1, %v2153_v33  ;;  %v329_v13 = vrot.slane %v316_v63, 4  ;;  %v320_v17 = vsel %vm129_vm1, %v305_v51, %v319_v2 }
 0x127   :  { %v2239_v12 = vsel %vm129_vm1, %v291_v0, %v274_v53  ;;  %v332_v18 = vsel %vm129_vm1, %v316_v63, %v331_v3  ;;  %v2244_v19 = vsel %vm129_vm1, %v287_v5, %v270_v52  ;;  %v328_v21 = vperm.slane %v320_v17, %v2153_v33 }
 0x128   :  { %v343_v20 = vrot.slane %v324_v11, 4  ;;  %v340_v22 = vperm.slane %v332_v18, %v2153_v33  ;;  %v330_v24 = vsel %vm129_vm1, %v329_v13, %v310_v55  ;;  %v375_v38 = vrot.slane %v350_v34, 4 }
 0x129   :  { %v336_v25 = vperm.slane %v330_v24, %v2153_v33  ;;  %v347_v26 = vrot.slane %v328_v21, 4  ;;  %v352_v14 = vpop.permute.xlu1 %351 }
 0x12a   :  { %v345_v23 = vrot.slane %v340_v22, 4  ;;  %v431_v5 = vrot.slane %v352_v14, 4 }
 0x12b   :  { %v341_v27 = vrot.slane %v336_v25, 4  ;;  %v2251_v28 = vsel %vm129_vm1, %v336_v25, %v343_v20  ;;  %v2257_v30 = vsel %vm129_vm1, %v340_v22, %v347_v26 }
 0x12c   :  { %v2254_v29 = vsel %vm129_vm1, %v345_v23, %v328_v21 }
 0x12d   :  { %v2260_v32 = vsel %vm129_vm1, %v341_v27, %v324_v11 }
 0x169   :  { %v362_v6 = vpop.permute.xlu2 %361 }
 0x16a   :  { %v385_v44 = vrot.slane %v362_v6, 4 }
 0x171   :  { %v356_v40 = vpop.permute.xlu2 %355  ;;  %v364_v43 = vpop.permute.xlu1 %363 }
 0x172   :  { %v443_v45 = vrot.slane %v356_v40, 4  ;;  %v441_v50 = vrot.slane %v364_v43, 4 }
 0x174   :  { %v444_v54 = vsel %vm129_vm1, %v364_v43, %v443_v45  ;;  %v442_v60 = vsel %vm129_vm1, %v441_v50, %v356_v40 }
 0x175   :  { %v452_v0 = vperm.slane %v444_v54, %v2131_v16  ;;  %v448_v13 = vperm.slane %v442_v60, %v2131_v16 }
 0x177   :  { %v465_v25 = vrot.slane %v452_v0, 4 }
 0x179   :  { %v358_v35 = vpop.permute.xlu0 %357 }
 0x17a   :  { %v373_v37 = vrot.slane %v358_v35, 4  ;;  %v376_v41 = vsel %vm129_vm1, %v358_v35, %v375_v38  ;;  %v453_v38 = vrot.slane %v448_v13, 4 }
 0x17b   :  { %v384_v46 = vperm.slane %v376_v41, %v2131_v16 }
 0x17c   :  { %v374_v39 = vsel %vm129_vm1, %v373_v37, %v350_v34 }
 0x17d   :  { %v380_v42 = vperm.slane %v374_v39, %v2131_v16  ;;  %v411_v55 = vrot.slane %v384_v46, 4 }
 0x17f   :  { %v399_v51 = vrot.slane %v380_v42, 4 }
 0x181   :  { %v354_v47 = vpop.permute.xlu0 %353 }
 0x182   :  { %v386_v48 = vsel %vm129_vm1, %v385_v44, %v354_v47  ;;  %v387_v49 = vrot.slane %v354_v47, 4 }
 0x183   :  { %v392_v52 = vperm.slane %v386_v48, %v2131_v16 }
 0x184   :  { %v388_v53 = vsel %vm129_vm1, %v362_v6, %v387_v49 }
 0x185   :  { %v396_v56 = vperm.slane %v388_v53, %v2131_v16  ;;  %v397_v57 = vrot.slane %v392_v52, 4  ;;  %v400_v58 = vsel %vm129_vm1, %v392_v52, %v399_v51 }
 0x186   :  { %v408_v59 = vperm.slane %v400_v58, %v2153_v33 }
 0x187   :  { %v398_v61 = vsel %vm129_vm1, %v397_v57, %v380_v42  ;;  %v409_v62 = vrot.slane %v396_v56, 4  ;;  %v412_v63 = vsel %vm129_vm1, %v396_v56, %v411_v55 }
 0x188   :  { %v404_v1 = vperm.slane %v398_v61, %v2153_v33  ;;  %v420_v2 = vperm.slane %v412_v63, %v2153_v33  ;;  %v423_v3 = vrot.slane %v408_v59, 4 }
 0x189   :  { %v410_v11 = vsel %vm129_vm1, %v409_v62, %v384_v46  ;;  %v360_v17 = vpop.permute.xlu0 %359 }
 0x18a   :  { %v416_v18 = vperm.slane %v410_v11, %v2153_v33  ;;  %v421_v20 = vrot.slane %v404_v1, 4  ;;  %v424_v21 = vsel %vm129_vm1, 0.0, %v423_v3  ;;  %v427_v22 = vrot.slane %v420_v2, 4 }
 0x18b   :  { %v490_v24 = vrot.slane %v424_v21, 4  ;;  %v429_v23 = vrot.slane %v360_v17, 4  ;;  %v432_v26 = vsel %vm129_vm1, %v360_v17, %v431_v5  ;;  %v485_v45 = vsel %vm129_vm1, %v423_v3, %v404_v1 }
 0x18c   :  { %v422_v27 = vsel %vm129_vm1, 0.0, %v421_v20  ;;  %v425_v34 = vrot.slane %v416_v18, 4  ;;  %v428_v6 = vsel %vm129_vm1, 0.0, %v427_v22  ;;  %v440_v35 = vperm.slane %v432_v26, %v2131_v16 }
 0x18d   :  { %v501_v37 = vrot.slane %v428_v6, 4  ;;  %v430_v39 = vsel %vm129_vm1, %v429_v23, %v352_v14  ;;  %v491_v40 = vsel %vm129_vm1, %v490_v24, %v422_v27  ;;  %v496_v51 = vsel %vm129_vm1, %v427_v22, %v416_v18 }
 0x18e   :  { %v436_v41 = vperm.slane %v430_v39, %v2131_v16  ;;  %v466_v42 = vsel %vm129_vm1, %v465_v25, %v440_v35  ;;  %v467_v43 = vrot.slane %v440_v35, 4  ;;  %v426_v44 = vsel %vm129_vm1, 0.0, %v425_v34 }
 0x18f   :  { %v472_v46 = vperm.slane %v466_v42, %v2153_v33  ;;  %v495_v47 = vperm.slane %v491_v40, %v2131_v16  ;;  %v502_v48 = vsel %vm129_vm1, %v501_v37, %v426_v44  ;;  %v489_v57 = vperm.slane %v485_v45, %v2131_v16 }
 0x190   :  { %v454_v49 = vsel %vm129_vm1, %v453_v38, %v436_v41  ;;  %v455_v14 = vrot.slane %v436_v41, 4  ;;  %v468_v50 = vsel %vm129_vm1, %v452_v0, %v467_v43  ;;  %v506_v55 = vperm.slane %v502_v48, %v2131_v16 }
 0x191   :  { %v460_v52 = vperm.slane %v454_v49, %v2153_v33  ;;  %v476_v53 = vperm.slane %v468_v50, %v2153_v33  ;;  %v481_v54 = vrot.slane %v472_v46, 4  ;;  %v507_v58 = vrot.slane %v495_v47, 4 }
 0x192   :  { %v456_v56 = vsel %vm129_vm1, %v448_v13, %v455_v14  ;;  %v500_v62 = vperm.slane %v496_v51, %v2131_v16  ;;  %v519_v1 = vrot.slane %v506_v55, 4  ;;  %v509_v35 = vrot.slane %v489_v57, 4 }
 0x193   :  { %v464_v59 = vperm.slane %v456_v56, %v2153_v33  ;;  %v477_v60 = vrot.slane %v460_v52, 4  ;;  %v483_v61 = vrot.slane %v476_v53, 4  ;;  %v482_v63 = vsel %vm129_vm1, 0.0, %v481_v54 }
 0x194   :  { %v508_v0 = vsel %vm129_vm1, %v507_v58, %v489_v57  ;;  %v520_v20 = vsel %vm129_vm1, %v519_v1, %v500_v62  ;;  %v521_v24 = vrot.slane %v500_v62, 4  ;;  %v510_v43 = vsel %vm129_vm1, %v495_v47, %v509_v35 }
 0x195   :  { %v478_v2 = vsel %vm129_vm1, 0.0, %v477_v60  ;;  %v479_v3 = vrot.slane %v464_v59, 4  ;;  %v484_v5 = vsel %vm129_vm1, 0.0, %v483_v61  ;;  %v550_v11 = vsel %vm129_vm1, %v483_v61, %v472_v46 }
 0x196   :  { %v554_v13 = vperm.slane %v550_v11, %v2131_v16  ;;  %v555_v17 = vrot.slane %v484_v5, 4  ;;  %v514_v18 = vperm.slane %v508_v0, %v2153_v33  ;;  %v526_v25 = vperm.slane %v520_v20, %v2153_v33 }
 0x197   :  { %v480_v21 = vsel %vm129_vm1, 0.0, %v479_v3  ;;  %v539_v22 = vsel %vm129_vm1, %v479_v3, %v460_v52  ;;  %v522_v37 = vsel %vm129_vm1, %v506_v55, %v521_v24  ;;  %v518_v48 = vperm.slane %v510_v43, %v2153_v33  ;;  %v837_v3 = vld [vmem:[#allocation2] sm:$0x3] }
 0x198   :  { %v544_v23 = vrot.slane %v480_v21, 4  ;;  %v556_v26 = vsel %vm129_vm1, %v555_v17, %v482_v63  ;;  %v575_v27 = vrot.slane %v554_v13, 4  ;;  %v533_v34 = vrot.slane %v514_v18, 4 }
 0x199   :  { %v560_v6 = vperm.slane %v556_v26, %v2131_v16  ;;  %v531_v38 = vrot.slane %v526_v25, 4  ;;  %v530_v40 = vperm.slane %v522_v37, %v2153_v33  ;;  %v543_v41 = vperm.slane %v539_v22, %v2131_v16 }
 0x19a   :  { %v534_v39 = vsel %vm129_vm1, %v526_v25, %v533_v34  ;;  %v545_v42 = vsel %vm129_vm1, %v544_v23, %v478_v2  ;;  %v537_v47 = vrot.slane %v518_v48, 4  ;;  %vm838_vm3 = vcmp.eq.f32.partialorder %v837_v3, 0.0 }
 0x19b   :  { %1826 = vmatpush.xpose.msk.msra.mxu2 %vm845_vm2, %v534_v39  ;;  %v532_v44 = vsel %vm129_vm1, %v531_v38, %v514_v18  ;;  %v549_v45 = vperm.slane %v545_v42, %v2131_v16  ;;  %v576_v46 = vsel %vm129_vm1, %v560_v6, %v575_v27  ;;  %v535_v49 = vrot.slane %v530_v40, 4 }
 0x19c   :  { %1824 = vmatpush.xpose.msk.msra.mxu1 %vm845_vm2, %v532_v44  ;;  %v563_v14 = vrot.slane %v543_v41, 4  ;;  %v584_v50 = vperm.slane %v576_v46, %v2153_v33  ;;  %v573_v52 = vrot.slane %v560_v6, 4  ;;  %v538_v59 = vsel %vm129_vm1, %v530_v40, %v537_v47 }
 0x19d   :  { %v561_v51 = vrot.slane %v549_v45, 4  ;;  %v536_v53 = vsel %vm129_vm1, %v535_v49, %v518_v48  ;;  %v1871_v47 = vpack.i.bf16 %v2151_v31, %v2129_v15 }
 0x19e   :  { %1827 = vmatmul.msk.f32.vlgmr.msra.gmra.mxu2 %vm845_vm2, %v2232_v4  ;;  %v564_v54 = vsel %vm129_vm1, %v549_v45, %v563_v14  ;;  %v589_v55 = vrot.slane %v584_v50, 4  ;;  %1828 = vmatpush.xpose.msk.msrb.mxu0 %vm845_vm2, %v536_v53  ;;  %v574_v58 = vsel %vm129_vm1, %v573_v52, %v554_v13 }
 0x19f   :  { %1825 = vmatmul.msk.f32.vlgmr.msra.gmra.mxu1 %vm845_vm2, %v2244_v19  ;;  %v572_v56 = vperm.slane %v564_v54, %v2153_v33  ;;  %v562_v57 = vsel %vm129_vm1, %v561_v51, %v543_v41  ;;  %v580_v4 = vperm.slane %v574_v58, %v2153_v33  ;;  %v1876_v54 = vpack.i.bf16 %v2158_v36, %v2109_v7 }
 0x1a0   :  { %v568_v60 = vperm.slane %v562_v57, %v2153_v33  ;;  %1830 = vmatpush.xpose.msk.msrb.mxu1 %vm845_vm2, %v538_v59 }
 0x1a1   :  { %v590_v61 = vsel %vm129_vm1, %v589_v55, %v572_v56  ;;  %v591_v62 = vrot.slane %v572_v56, 4  ;;  %1829 = vmatmul.msk.f32.vlgmr.msrb.gmra.mxu0 %vm845_vm2, %v2239_v12  ;;  %v585_v19 = vrot.slane %v580_v4, 4  ;;  %v2038_v12 = vmov 0   ;;  %v2399_v56 = vpop.permute.xlu0 %1867 }
 0x1a2   :  { %v587_v63 = vrot.slane %v568_v60, 4  ;;  %1887 = vset.pattern.permute.xlu0 %v2038_v12  ;;  %1886 = vset.pattern.permute.xlu2 %v2038_v12  ;;  %v1881_v55 = vpack.i.bf16 %v2121_v9, %v2119_v8 }
 0x1a3   :  { %v592_v0 = vsel %vm129_vm1, %v584_v50, %v591_v62  ;;  %v586_v1 = vsel %vm129_vm1, %v585_v19, %v568_v60 }
 0x1a4   :  { %1836 = vmatpush.xpose.msk.msra.mxu1 %vm845_vm2, %v590_v61  ;;  %v588_v2 = vsel %vm129_vm1, %v580_v4, %v587_v63  ;;  %1832 = vmatpush.xpose.msk.msrb.mxu2 %vm845_vm2, %v586_v1 }
 0x1a5   :  { %1834 = vmatpush.xpose.msk.msra.mxu3 %vm845_vm2, %v588_v2 }
 0x1a7   :  { %1831 = vmatmul.msk.f32.vlgmr.msrb.gmra.mxu1 %vm845_vm2, %v2235_v10  ;;  %1833 = vmatmul.msk.f32.vlgmr.msrb.gmra.mxu2 %vm845_vm2, %v2260_v32  ;;  %v839_v10 = vsel %vm838_vm3, 1, %v2038_v12 }
 0x1a8   :  { %1838 = vmatpush.xpose.msk.msra.mxu2 %vm845_vm2, %v592_v0  ;;  %1835 = vmatmul.msk.f32.vlgmr.msra.gmra.mxu3 %vm845_vm2, %v2251_v28  ;;  %v1064_v5 = vperm.slane %v839_v10, 0  ;;  %v840_v13 = vrot.slane %v839_v10, 1 }
 0x1aa   :  { %vm2369_vm4 = vcmp.eq.s32.totalorder %v1064_v5, 1  ;;  %vm841_vm5 = vcmp.ne.s32.totalorder %v840_v13, 0 }
 0x1ab   :  { %v1063_v23 = vsel %vm841_vm5, 1, %v2038_v12 }
 0x1ac   :  { %v1065_v6 = vperm.slane %v1063_v23, 0 }
 0x1ae   :  { %vm1067_vm6 = vcmp.eq.s32.totalorder %v1065_v6, 1  ;;  %v1870_v6 = vunpack.i.h.bf16 %v2399_v56 }
 0x1af   :  { %1837 = vmatmul.msk.f32.vlgmr.msra.gmra.mxu1 %vm845_vm2, %v2254_v29  ;;  %1839 = vmatmul.msk.f32.vlgmr.msra.gmra.mxu2 %vm845_vm2, %v2257_v30 }
 0x21c   :  { %v869_v32 = vpop.f32.mrf.mxu1 }
 0x21d   :  { %v1054_v11 = vmul.f32 0.35355338, %v869_v32 }
 0x21e   :  { %v921_v29 = vpop.f32.mrf.mxu0 }
 0x21f   :  { %v1068_v30 = vsel %vm2369_vm4, -1e+10, %v1054_v11  ;;  %v1056_v17 = vmul.f32 0.35355338, %v921_v29 }
 0x220   :  { %v1076_v18 = vsel %vm845_vm2, %v1068_v30, -inf }
 0x221   :  { %v895_v20 = vpop.f32.mrf.mxu2  ;;  %1077 = vmax.xlane.f32.xlu2 %v1076_v18  ;;  %v1070_v21 = vsel %vm2369_vm4, -1e+10, %v1056_v17 }
 0x222   :  { %v1055_v22 = vmul.f32 0.35355338, %v895_v20  ;;  %v1082_v24 = vsel %vm845_vm2, %v1070_v21, -inf }
 0x223   :  { %1083 = vmax.xlane.f32.xlu1 %v1082_v24 }
 0x224   :  { %v947_v25 = vpop.f32.mrf.mxu1  ;;  %v1069_v27 = vsel %vm2369_vm4, -1e+10, %v1055_v22 }
 0x225   :  { %v1057_v26 = vmul.f32 0.35355338, %v947_v25  ;;  %v1079_v35 = vsel %vm845_vm2, %v1069_v27, -inf }
 0x227   :  { %v1071_v34 = vsel %vm2369_vm4, -1e+10, %v1057_v26 }
 0x228   :  { %v1085_v37 = vsel %vm845_vm2, %v1071_v34, -inf }
 0x229   :  { %1080 = vmax.xlane.f32.xlu2 %v1079_v35  ;;  %1086 = vmax.xlane.f32.xlu0 %v1085_v37  ;;  %v1869_v35 = vunpack.i.l.bf16 %v2399_v56 }
 0x22a   :  { %v973_v38 = vpop.f32.mrf.mxu2 }
 0x22b   :  { %v1058_v39 = vmul.f32 0.35355338, %v973_v38  ;;  %v999_v42 = vpop.f32.mrf.mxu3 }
 0x22c   :  { %v1025_v40 = vpop.f32.mrf.mxu1  ;;  %v1059_v48 = vmul.f32 0.35355338, %v999_v42 }
 0x22d   :  { %v1060_v41 = vmul.f32 0.35355338, %v1025_v40  ;;  %v1072_v43 = vsel %vm1067_vm6, -1e+10, %v1058_v39  ;;  %v631_v39 = vrot.slane %v1870_v6, 4  ;;  %v619_v40 = vrot.slane %v1869_v35, 4 }
 0x22e   :  { %v1088_v46 = vsel %vm845_vm2, %v1072_v43, -inf  ;;  %v1073_v50 = vsel %vm1067_vm6, -1e+10, %v1059_v48 }
 0x22f   :  { %v1074_v44 = vsel %vm1067_vm6, -1e+10, %v1060_v41  ;;  %v1091_v53 = vsel %vm845_vm2, %v1073_v50, -inf }
 0x230   :  { %v1094_v45 = vsel %vm845_vm2, %v1074_v44, -inf }
 0x231   :  { %1095 = vmax.xlane.f32.xlu1 %v1094_v45  ;;  %1089 = vmax.xlane.f32.xlu2 %v1088_v46 }
 0x232   :  { %v1051_v49 = vpop.f32.mrf.mxu2 }
 0x233   :  { %v1061_v14 = vmul.f32 0.35355338, %v1051_v49 }
 0x235   :  { %v1075_v51 = vsel %vm1067_vm6, -1e+10, %v1061_v14 }
 0x236   :  { %v1097_v52 = vsel %vm845_vm2, %v1075_v51, -inf }
 0x237   :  { %1098 = vmax.xlane.f32.xlu0 %v1097_v52 }
 0x239   :  { %1092 = vmax.xlane.f32.xlu2 %v1091_v53 }
 0x24a   :  { %1872 = vrot.lane.b32.xlu1 %v1871_v47, %s2037_s22 }
 0x24b   :  { %1877 = vrot.lane.b32.xlu0 %v1876_v54, %s2037_s22 }
 0x251   :  { %1882 = vrot.lane.b32.xlu2 %v1881_v55, %s2037_s22 }
 0x294   :  { %v1078_v57 = vpop.xlane.xlu2 %1077 }
 0x295   :  { %v1100_v58 = vsub.f32 %v1068_v30, %v1078_v57 }
 0x296   :  { %v1084_v59 = vpop.xlane.xlu1 %1083 }
 0x297   :  { %v1108_v60 = vmul.f32 1.442695, %v1100_v58  ;;  %v1102_v4 = vsub.f32 %v1070_v21, %v1084_v59 }
 0x299   :  { %1890 = vpow2.f32 %v1108_v60  ;;  %v1112_v15 = vmul.f32 1.442695, %v1102_v4 }
 0x29b   :  { %1892 = vpow2.f32 %v1112_v15 }
 0x29c   :  { %v1081_v31 = vpop.xlane.xlu2 %1080  ;;  %v1087_v61 = vpop.xlane.xlu0 %1086 }
 0x29d   :  { %v1101_v7 = vsub.f32 %v1069_v27, %v1081_v31  ;;  %v1103_v36 = vsub.f32 %v1071_v34, %v1087_v61 }
 0x29f   :  { %v2401_v62 = vpop.eup %1890  ;;  %v1110_v19 = vmul.f32 1.442695, %v1101_v7  ;;  %v1114_v8 = vmul.f32 1.442695, %v1103_v36 }
 0x2a0   :  { %v1124_v9 = vsel %vm845_vm2, %v2401_v62, 0.0 }
 0x2a1   :  { %1894 = vpow2.f32 %v1110_v19  ;;  %1125 = vadd.xlane.f32.xlu2 %v1124_v9  ;;  %v2405_v63 = vpop.eup %1892 }
 0x2a2   :  { %1896 = vpow2.f32 %v1114_v8  ;;  %v1130_v0 = vsel %vm845_vm2, %v2405_v63, 0.0 }
 0x2a3   :  { %1131 = vadd.xlane.f32.xlu1 %v1130_v0 }
 0x2a4   :  { %v1096_v1 = vpop.xlane.xlu1 %1095  ;;  %v1090_v2 = vpop.xlane.xlu2 %1089 }
 0x2a5   :  { %v1106_v3 = vsub.f32 %v1074_v44, %v1096_v1  ;;  %v1104_v10 = vsub.f32 %v1072_v43, %v1090_v2 }
 0x2a7   :  { %v2409_v5 = vpop.eup %1894  ;;  %v1120_v32 = vmul.f32 1.442695, %v1106_v3  ;;  %v1116_v11 = vmul.f32 1.442695, %v1104_v10 }
 0x2a8   :  { %v2411_v13 = vpop.eup %1896  ;;  %v1127_v28 = vsel %vm845_vm2, %v2409_v5, 0.0 }
 0x2a9   :  { %1898 = vpow2.f32 %v1120_v32  ;;  %v1133_v29 = vsel %vm845_vm2, %v2411_v13, 0.0  ;;  %1128 = vadd.xlane.f32.xlu0 %v1127_v28 }
 0x2aa   :  { %1900 = vpow2.f32 %v1116_v11  ;;  %1134 = vadd.xlane.f32.xlu2 %v1133_v29  ;;  %v1099_v30 = vpop.xlane.xlu0 %1098 }
 0x2ab   :  { %v1107_v17 = vsub.f32 %v1075_v51, %v1099_v30 }
 0x2ac   :  { %v1093_v18 = vpop.xlane.xlu2 %1092 }
 0x2ad   :  { %v1105_v20 = vsub.f32 %v1073_v50, %v1093_v18  ;;  %v1122_v21 = vmul.f32 1.442695, %v1107_v17 }
 0x2af   :  { %v2417_v22 = vpop.eup %1898  ;;  %1902 = vpow2.f32 %v1122_v21  ;;  %v1118_v23 = vmul.f32 1.442695, %v1105_v20 }
 0x2b0   :  { %v2419_v24 = vpop.eup %1900  ;;  %v1142_v25 = vsel %vm845_vm2, %v2417_v22, 0.0 }
 0x2b1   :  { %v1136_v26 = vsel %vm845_vm2, %v2419_v24, 0.0  ;;  %1143 = vadd.xlane.f32.xlu0 %v1142_v25  ;;  %1904 = vpow2.f32 %v1118_v23 }
 0x2b2   :  { %1137 = vadd.xlane.f32.xlu2 %v1136_v26 }
 0x2b4   :  { %v1883_v37 = vpop.permute.xlu2 %1882 }
 0x2b5   :  { %v2425_v27 = vpop.eup %1902  ;;  %v1885_v42 = vunpack.i.h.bf16 %v1883_v37  ;;  %v1884_v43 = vunpack.i.l.bf16 %v1883_v37 }
 0x2b6   :  { %v1145_v34 = vsel %vm845_vm2, %v2425_v27, 0.0 }
 0x2b7   :  { %1146 = vadd.xlane.f32.xlu1 %v1145_v34  ;;  %v2431_v38 = vpop.eup %1904  ;;  %v685_v55 = vrot.slane %v1885_v42, 4  ;;  %v673_v56 = vrot.slane %v1884_v43, 4 }
 0x2b8   :  { %v1139_v48 = vsel %vm845_vm2, %v2431_v38, 0.0 }
 0x2bc   :  { %v1873_v41 = vpop.permute.xlu1 %1872 }
 0x2bd   :  { %v1875_v44 = vunpack.i.h.bf16 %v1873_v41  ;;  %v1874_v45 = vunpack.i.l.bf16 %v1873_v41  ;;  %v1878_v46 = vpop.permute.xlu0 %1877 }
 0x2be   :  { %v1880_v47 = vunpack.i.h.bf16 %v1878_v46  ;;  %v1879_v54 = vunpack.i.l.bf16 %v1878_v46 }
 0x2bf   :  { %v629_v49 = vrot.slane %v1875_v44, 4  ;;  %v632_v14 = vsel %vm129_vm1, %v1875_v44, %v631_v39  ;;  %v617_v50 = vrot.slane %v1874_v45, 4  ;;  %v620_v51 = vsel %vm129_vm1, %v1874_v45, %v619_v40  ;;  %1140 = vadd.xlane.f32.xlu1 %v1139_v48 }
 0x2c0   :  { %v640_v52 = vperm.slane %v632_v14, %v2131_v16  ;;  %v628_v53 = vperm.slane %v620_v51, %v2131_v16  ;;  %v686_v31 = vsel %vm129_vm1, %v685_v55, %v1880_v47  ;;  %v687_v61 = vrot.slane %v1880_v47, 4 }
 0x2c1   :  { %v630_v57 = vsel %vm129_vm1, %v629_v49, %v1870_v6  ;;  %v618_v58 = vsel %vm129_vm1, %v617_v50, %v1869_v35  ;;  %v674_v7 = vsel %vm129_vm1, %v673_v56, %v1879_v54  ;;  %v675_v36 = vrot.slane %v1879_v54, 4 }
 0x2c2   :  { %v636_v59 = vperm.slane %v630_v57, %v2131_v16  ;;  %v653_v60 = vrot.slane %v640_v52, 4  ;;  %v624_v4 = vperm.slane %v618_v58, %v2131_v16  ;;  %v655_v15 = vrot.slane %v628_v53, 4 }
 0x2c3   :  { %v688_v3 = vsel %vm129_vm1, %v1885_v42, %v687_v61  ;;  %v692_v10 = vperm.slane %v686_v31, %v2131_v16  ;;  %v676_v29 = vsel %vm129_vm1, %v1884_v43, %v675_v36  ;;  %v680_v23 = vperm.slane %v674_v7, %v2131_v16 }
 0x2c4   :  { %v641_v19 = vrot.slane %v636_v59, 4  ;;  %v643_v8 = vrot.slane %v624_v4, 4  ;;  %v654_v9 = vsel %vm129_vm1, %v653_v60, %v628_v53  ;;  %v656_v0 = vsel %vm129_vm1, %v640_v52, %v655_v15 }
 0x2c5   :  { %v660_v1 = vperm.slane %v654_v9, %v2153_v33  ;;  %v664_v2 = vperm.slane %v656_v0, %v2153_v33  ;;  %v696_v28 = vperm.slane %v688_v3, %v2131_v16  ;;  %v697_v21 = vrot.slane %v692_v10, 4 }
 0x2c6   :  { %v642_v32 = vsel %vm129_vm1, %v641_v19, %v624_v4  ;;  %v644_v11 = vsel %vm129_vm1, %v636_v59, %v643_v8  ;;  %v684_v26 = vperm.slane %v676_v29, %v2131_v16  ;;  %v699_v42 = vrot.slane %v680_v23, 4 }
 0x2c7   :  { %v648_v30 = vperm.slane %v642_v32, %v2153_v33  ;;  %v652_v17 = vperm.slane %v644_v11, %v2153_v33  ;;  %v669_v18 = vrot.slane %v660_v1, 4  ;;  %v671_v20 = vrot.slane %v664_v2, 4 }
 0x2c8   :  { %v709_v25 = vrot.slane %v696_v28, 4  ;;  %v698_v41 = vsel %vm129_vm1, %v697_v21, %v680_v23  ;;  %v711_v46 = vrot.slane %v684_v26, 4  ;;  %v700_v49 = vsel %vm129_vm1, %v692_v10, %v699_v42 }
 0x2c9   :  { %v665_v34 = vrot.slane %v648_v30, 4  ;;  %v667_v6 = vrot.slane %v652_v17, 4  ;;  %v670_v35 = vsel %vm129_vm1, 0.0, %v669_v18  ;;  %v672_v37 = vsel %vm129_vm1, 0.0, %v671_v20 }
 0x2ca   :  { %v740_v39 = vsel %vm129_vm1, %v671_v20, %v660_v1  ;;  %v745_v40 = vrot.slane %v672_v37, 4  ;;  %v704_v44 = vperm.slane %v698_v41, %v2153_v33  ;;  %v710_v45 = vsel %vm129_vm1, %v709_v25, %v684_v26 }
 0x2cb   :  { %v668_v43 = vsel %vm129_vm1, 0.0, %v667_v6  ;;  %v716_v14 = vperm.slane %v710_v45, %v2153_v33  ;;  %v666_v50 = vsel %vm129_vm1, 0.0, %v665_v34  ;;  %v708_v51 = vperm.slane %v700_v49, %v2153_v33 }
 0x2cc   :  { %v734_v48 = vrot.slane %v668_v43, 4  ;;  %v712_v52 = vsel %vm129_vm1, %v696_v28, %v711_v46  ;;  %v721_v53 = vrot.slane %v704_v44, 4  ;;  %v729_v47 = vsel %vm129_vm1, %v667_v6, %v648_v30 }
 0x2cd   :  { %v720_v54 = vperm.slane %v712_v52, %v2153_v33  ;;  %v725_v55 = vrot.slane %v716_v14, 4  ;;  %v733_v56 = vperm.slane %v729_v47, %v2131_v16  ;;  %v723_v58 = vrot.slane %v708_v51, 4 }
 0x2ce   :  { %v735_v57 = vsel %vm129_vm1, %v734_v48, %v666_v50  ;;  %v744_v60 = vperm.slane %v740_v39, %v2131_v16  ;;  %v746_v4 = vsel %vm129_vm1, %v745_v40, %v670_v35  ;;  %v722_v7 = vsel %vm129_vm1, 0.0, %v721_v53 }
 0x2cf   :  { %v739_v59 = vperm.slane %v735_v57, %v2131_v16  ;;  %v727_v15 = vrot.slane %v720_v54, 4  ;;  %v750_v31 = vperm.slane %v746_v4, %v2131_v16  ;;  %v753_v61 = vrot.slane %v733_v56, 4 }
 0x2d0   :  { %v724_v36 = vsel %vm129_vm1, 0.0, %v723_v58  ;;  %v765_v19 = vrot.slane %v744_v60, 4  ;;  %v726_v9 = vsel %vm129_vm1, 0.0, %v725_v55  ;;  %v783_v18 = vsel %vm129_vm1, %v723_v58, %v704_v44 }
 0x2d1   :  { %v751_v8 = vrot.slane %v739_v59, 4  ;;  %v728_v0 = vsel %vm129_vm1, 0.0, %v727_v15  ;;  %v788_v1 = vrot.slane %v724_v36, 4  ;;  %v754_v2 = vsel %vm129_vm1, %v739_v59, %v753_v61 }
 0x2d2   :  { %v763_v3 = vrot.slane %v750_v31, 4  ;;  %v799_v10 = vrot.slane %v728_v0, 4  ;;  %v762_v32 = vperm.slane %v754_v2, %v2153_v33  ;;  %v766_v11 = vsel %vm129_vm1, %v750_v31, %v765_v19 }
 0x2d3   :  { %v752_v28 = vsel %vm129_vm1, %v751_v8, %v733_v56  ;;  %v774_v29 = vperm.slane %v766_v11, %v2153_v33  ;;  %v787_v25 = vperm.slane %v783_v18, %v2131_v16  ;;  %v789_v23 = vsel %vm129_vm1, %v788_v1, %v722_v7 }
 0x2d4   :  { %v758_v30 = vperm.slane %v752_v28, %v2153_v33  ;;  %v764_v17 = vsel %vm129_vm1, %v763_v3, %v744_v60  ;;  %v781_v21 = vrot.slane %v762_v32, 4  ;;  %v793_v6 = vperm.slane %v789_v23, %v2131_v16 }
 0x2d5   :  { %v770_v20 = vperm.slane %v764_v17, %v2153_v33  ;;  %v779_v26 = vrot.slane %v774_v29, 4  ;;  %v794_v35 = vsel %vm129_vm1, %v727_v15, %v716_v14  ;;  %v800_v41 = vsel %vm129_vm1, %v799_v10, %v726_v9 }
 0x2d6   :  { %v777_v34 = vrot.slane %v758_v30, 4  ;;  %v782_v39 = vsel %vm129_vm1, %v774_v29, %v781_v21  ;;  %v798_v40 = vperm.slane %v794_v35, %v2131_v16  ;;  %v804_v43 = vperm.slane %v800_v41, %v2131_v16 }
 0x2d7   :  { %v775_v37 = vrot.slane %v770_v20, 4  ;;  %v780_v42 = vsel %vm129_vm1, %v779_v26, %v762_v32  ;;  %1355 = vmatpush.msrb.mxu2 %v782_v39  ;;  %v807_v44 = vrot.slane %v787_v25, 4  ;;  %v805_v49 = vrot.slane %v793_v6, 4 }
 0x2d8   :  { %v778_v45 = vsel %vm129_vm1, %v770_v20, %v777_v34  ;;  %1332 = vmatpush.msrb.mxu1 %v780_v42  ;;  %v819_v48 = vrot.slane %v798_v40, 4  ;;  %v817_v50 = vrot.slane %v804_v43, 4 }
 0x2d9   :  { %v776_v46 = vsel %vm129_vm1, %v775_v37, %v758_v30  ;;  %1309 = vmatpush.msra.mxu0 %v778_v45  ;;  %v808_v14 = vsel %vm129_vm1, %v793_v6, %v807_v44  ;;  %v806_v53 = vsel %vm129_vm1, %v805_v49, %v787_v25 }
 0x2da   :  { %1286 = vmatpush.msrb.mxu3 %v776_v46  ;;  %v816_v51 = vperm.slane %v808_v14, %v2153_v33  ;;  %v820_v52 = vsel %vm129_vm1, %v804_v43, %v819_v48  ;;  %v812_v54 = vperm.slane %v806_v53, %v2153_v33  ;;  %v818_v55 = vsel %vm129_vm1, %v817_v50, %v798_v40 }
 0x2db   :  { %v828_v47 = vperm.slane %v820_v52, %v2153_v33  ;;  %v824_v57 = vperm.slane %v818_v55, %v2153_v33 }
 0x2dc   :  { %v835_v56 = vrot.slane %v816_v51, 4  ;;  %v831_v59 = vrot.slane %v812_v54, 4 }
 0x2dd   :  { %v833_v58 = vrot.slane %v828_v47, 4  ;;  %v829_v4 = vrot.slane %v824_v57, 4 }
 0x2de   :  { %v836_v60 = vsel %vm129_vm1, %v828_v47, %v835_v56  ;;  %v832_v31 = vsel %vm129_vm1, %v824_v57, %v831_v59 }
 0x2df   :  { %v834_v15 = vsel %vm129_vm1, %v833_v58, %v816_v51  ;;  %1447 = vmatpush.msra.mxu2 %v836_v60  ;;  %v830_v61 = vsel %vm129_vm1, %v829_v4, %v812_v54  ;;  %1401 = vmatpush.msrb.mxu0 %v832_v31 }
 0x2e0   :  { %1424 = vmatpush.msra.mxu1 %v834_v15  ;;  %1378 = vmatpush.msra.mxu3 %v830_v61 }
 0x314   :  { %v1126_v7 = vpop.xlane.xlu2 %1125 }
 0x315   :  { %1906 = vrcp.f32 %v1126_v7  ;;  %v1157_v32 = vand.u32 2147483647, %v1126_v7  ;;  %v1159_v11 = vand.u32 2147483648, %v1126_v7  ;;  %vm1153_vm9 = vweird.f32 %v1126_v7 }
 0x316   :  { %v1132_v36 = vpop.xlane.xlu1 %1131 }
 0x317   :  { %1908 = vrcp.f32 %v1132_v36  ;;  %v1187_v29 = vand.u32 2147483647, %v1132_v36  ;;  %v1189_v30 = vand.u32 2147483648, %v1132_v36  ;;  %vm1183_vm10 = vweird.f32 %v1132_v36 }
 0x318   :  { %vm2518_vm11 = vcmp.eq.f32.partialorder %v1157_v32, 8.507059e+37  ;;  %v1160_v23 = vor.u32 1.1754944e-38, %v1159_v11 }
 0x319   :  { %vm1188_vm12 = vcmp.eq.f32.partialorder %v1187_v29, 8.507059e+37  ;;  %v1190_v40 = vor.u32 1.1754944e-38, %v1189_v30 }
 0x31b   :  { %v1907_v19 = vpop.eup %1906 }
 0x31c   :  { %v1149_v8 = vmul.f32 %v1907_v19, %v1126_v7  ;;  %v1129_v9 = vpop.xlane.xlu0 %1128  ;;  %vm1154_vm7 = vweird.f32 %v1907_v19 }
 0x31d   :  { %v2515_v0 = vpop.xlane.xlu2 %1134  ;;  %1910 = vrcp.f32 %v1129_v9  ;;  %v1909_v1 = vpop.eup %1908  ;;  %vm2524_vm13 = vmor %vm1153_vm9, %vm1154_vm7  ;;  %v1172_v42 = vand.u32 2147483647, %v1129_v9  ;;  %v1174_v45 = vand.u32 2147483648, %v1129_v9  ;;  %vm1168_vm5 = vweird.f32 %v1129_v9 }
 0x31e   :  { %v1150_v2 = vsub.f32 1.0, %v1149_v8  ;;  %1912 = vrcp.f32 %v2515_v0  ;;  %v1179_v3 = vmul.f32 %v1909_v1, %v1132_v36  ;;  %vm1184_vm8 = vweird.f32 %v1909_v1 }
 0x31f   :  { %vm1185_vm14 = vmor %vm1183_vm10, %vm1184_vm8  ;;  %v1204_v49 = vand.u32 2147483648, %v2515_v0  ;;  %v1202_v51 = vand.u32 2147483647, %v2515_v0  ;;  %vm1198_vm4 = vweird.f32 %v2515_v0  ;;  %vm1173_vm7 = vcmp.eq.f32.partialorder %v1172_v42, 8.507059e+37 }
 0x320   :  { %v1151_v10 = vmul.f32 %v1907_v19, %v1150_v2  ;;  %v1180_v28 = vsub.f32 1.0, %v1179_v3  ;;  %v1175_v56 = vor.u32 1.1754944e-38, %v1174_v45 }
 0x321   :  { %vm1203_vm9 = vcmp.eq.f32.partialorder %v1202_v51, 8.507059e+37 }
 0x322   :  { %v1181_v18 = vmul.f32 %v1909_v1, %v1180_v28  ;;  %v1152_v20 = vadd.f32 %v1907_v19, %v1151_v10 }
 0x323   :  { %v1911_v17 = vpop.eup %1910 }
 0x324   :  { %v1913_v21 = vpop.eup %1912  ;;  %v1164_v26 = vmul.f32 %v1911_v17, %v1129_v9  ;;  %v2522_v34 = vpop.xlane.xlu0 %1143  ;;  %v1182_v6 = vadd.f32 %v1909_v1, %v1181_v18  ;;  %v1156_v46 = vsel %vm2524_vm13, %v1907_v19, %v1152_v20  ;;  %vm1169_vm15 = vweird.f32 %v1911_v17 }
 0x325   :  { %v1194_v37 = vmul.f32 %v1913_v21, %v2515_v0  ;;  %v2529_v39 = vpop.xlane.xlu2 %1137  ;;  %1914 = vrcp.f32 %v2522_v34  ;;  %vm1199_vm3 = vweird.f32 %v1913_v21  ;;  %v1161_v47 = vsel %vm2518_vm11, %v1160_v23, %v1156_v46  ;;  %vm1170_vm6 = vmor %vm1168_vm5, %vm1169_vm15 }
 0x326   :  { %v1165_v41 = vsub.f32 1.0, %v1164_v26  ;;  %1916 = vrcp.f32 %v2529_v39  ;;  %v1186_v43 = vsel %vm1185_vm14, %v1909_v1, %v1182_v6  ;;  %v1162_v57 = vmul.f32 %v2401_v62, %v1161_v47  ;;  %vm1200_vm8 = vmor %vm1198_vm4, %vm1199_vm3 }
 0x327   :  { %v1195_v44 = vsub.f32 1.0, %v1194_v37  ;;  %v1191_v48 = vsel %vm1188_vm12, %v1190_v40, %v1186_v43  ;;  %v1249_v62 = vand.u32 2147483648, %v2522_v34  ;;  %v1219_v0 = vand.u32 2147483648, %v2529_v39 }
 0x328   :  { %v1166_v14 = vmul.f32 %v1911_v17, %v1165_v41  ;;  %v1192_v52 = vmul.f32 %v2405_v63, %v1191_v48  ;;  %v1205_v63 = vor.u32 1.1754944e-38, %v1204_v49  ;;  %1840 = vmatmul.msk.f32.vlgmr.msrb.gmra.mxu3 %vm845_vm2, %v1162_v57  ;;  %v1247_v2 = vand.u32 2147483647, %v2522_v34 }
 0x329   :  { %v1196_v50 = vmul.f32 %v1913_v21, %v1195_v44  ;;  %v1217_v10 = vand.u32 2147483647, %v2529_v39  ;;  %vm1243_vm12 = vweird.f32 %v2522_v34  ;;  %vm1213_vm13 = vweird.f32 %v2529_v39 }
 0x32a   :  { %v1167_v53 = vadd.f32 %v1911_v17, %v1166_v14  ;;  %1842 = vmatmul.msk.f32.vlgmr.msrb.gmra.mxu1 %vm845_vm2, %v1192_v52  ;;  %v1147_v58 = vpop.xlane.xlu1 %1146  ;;  %v1220_v30 = vor.u32 1.1754944e-38, %v1219_v0  ;;  %vm1248_vm3 = vcmp.eq.f32.partialorder %v1247_v2, 8.507059e+37 }
 0x32b   :  { %v1915_v54 = vpop.eup %1914  ;;  %v1197_v55 = vadd.f32 %v1913_v21, %v1196_v50  ;;  %1918 = vrcp.f32 %v1147_v58  ;;  %vm1218_vm4 = vcmp.eq.f32.partialorder %v1217_v10, 8.507059e+37  ;;  %v1264_v23 = vand.u32 2147483648, %v1147_v58 }
 0x32c   :  { %v1917_v59 = vpop.eup %1916  ;;  %v1171_v60 = vsel %vm1170_vm6, %v1911_v17, %v1167_v53  ;;  %v1239_v4 = vmul.f32 %v1915_v54, %v2522_v34  ;;  %vm1244_vm10 = vweird.f32 %v1915_v54  ;;  %v1262_v6 = vand.u32 2147483647, %v1147_v58 }
 0x32d   :  { %v1201_v15 = vsel %vm1200_vm8, %v1913_v21, %v1197_v55  ;;  %v1176_v31 = vsel %vm1173_vm7, %v1175_v56, %v1171_v60  ;;  %v1209_v61 = vmul.f32 %v1917_v59, %v2529_v39  ;;  %vm1214_vm11 = vweird.f32 %v1917_v59  ;;  %vm1245_vm14 = vmor %vm1243_vm12, %vm1244_vm10 }
 0x32e   :  { %v1206_v7 = vsel %vm1203_vm9, %v1205_v63, %v1201_v15  ;;  %v1240_v36 = vsub.f32 1.0, %v1239_v4  ;;  %v1177_v8 = vmul.f32 %v2409_v5, %v1176_v31  ;;  %vm1215_vm15 = vmor %vm1213_vm13, %vm1214_vm11  ;;  %vm1258_vm6 = vweird.f32 %v1147_v58 }
 0x32f   :  { %v1210_v19 = vsub.f32 1.0, %v1209_v61  ;;  %v1207_v9 = vmul.f32 %v2411_v13, %v1206_v7  ;;  %v1250_v13 = vor.u32 1.1754944e-38, %v1249_v62  ;;  %v1265_v40 = vor.u32 1.1754944e-38, %v1264_v23 }
 0x330   :  { %v1241_v1 = vmul.f32 %v1915_v54, %v1240_v36  ;;  %1841 = vmatmul.msk.f32.vlgmr.msra.gmra.mxu0 %vm845_vm2, %v1177_v8  ;;  %vm1263_vm8 = vcmp.eq.f32.partialorder %v1262_v6, 8.507059e+37 }
 0x331   :  { %v1211_v3 = vmul.f32 %v1917_v59, %v1210_v19  ;;  %1843 = vmatmul.msk.f32.vlgmr.msrb.gmra.mxu2 %vm845_vm2, %v1207_v9  ;;  %v1919_v32 = vpop.eup %1918 }
 0x332   :  { %v1242_v11 = vadd.f32 %v1915_v54, %v1241_v1  ;;  %v1254_v28 = vmul.f32 %v1919_v32, %v1147_v58  ;;  %v1141_v29 = vpop.xlane.xlu1 %1140  ;;  %vm1259_vm5 = vweird.f32 %v1919_v32 }
 0x333   :  { %v1212_v5 = vadd.f32 %v1917_v59, %v1211_v3  ;;  %1920 = vrcp.f32 %v1141_v29  ;;  %vm1260_vm7 = vmor %vm1258_vm6, %vm1259_vm5  ;;  %v1234_v45 = vand.u32 2147483648, %v1141_v29  ;;  %vm1228_vm10 = vweird.f32 %v1141_v29 }
 0x334   :  { %v1246_v17 = vsel %vm1245_vm14, %v1915_v54, %v1242_v11  ;;  %v1255_v21 = vsub.f32 1.0, %v1254_v28  ;;  %vm1698_vm14 = vcmask 130048  }
 0x335   :  { %v1216_v18 = vsel %vm1215_vm15, %v1917_v59, %v1212_v5  ;;  %v1251_v20 = vsel %vm1248_vm3, %v1250_v13, %v1246_v17  ;;  %v1235_v49 = vor.u32 1.1754944e-38, %v1234_v45  ;;  %vm1701_vm15 = vcmask 195584  }
 0x336   :  { %v1221_v25 = vsel %vm1218_vm4, %v1220_v30, %v1216_v18  ;;  %v1252_v26 = vmul.f32 %v2417_v22, %v1251_v20  ;;  %v1256_v34 = vmul.f32 %v1919_v32, %v1255_v21 }
 0x337   :  { %v1222_v35 = vmul.f32 %v2419_v24, %v1221_v25  ;;  %v1232_v24 = vand.u32 2147483647, %v1141_v29 }
 0x338   :  { %1846 = vmatmul.msk.f32.vlgmr.msra.gmra.mxu1 %vm845_vm2, %v1252_v26  ;;  %v1257_v37 = vadd.f32 %v1919_v32, %v1256_v34 }
 0x339   :  { %1844 = vmatmul.msk.f32.vlgmr.msra.gmra.mxu3 %vm845_vm2, %v1222_v35  ;;  %v1921_v39 = vpop.eup %1920  ;;  %vm1233_vm12 = vcmp.eq.f32.partialorder %v1232_v24, 8.507059e+37 }
 0x33a   :  { %v1261_v41 = vsel %vm1260_vm7, %v1919_v32, %v1257_v37  ;;  %v1224_v42 = vmul.f32 %v1921_v39, %v1141_v29  ;;  %vm1229_vm9 = vweird.f32 %v1921_v39 }
 0x33b   :  { %v1266_v43 = vsel %vm1263_vm8, %v1265_v40, %v1261_v41  ;;  %vm1230_vm11 = vmor %vm1228_vm10, %vm1229_vm9 }
 0x33c   :  { %v1225_v44 = vsub.f32 1.0, %v1224_v42  ;;  %v1267_v22 = vmul.f32 %v2425_v27, %v1266_v43 }
 0x33e   :  { %v1226_v46 = vmul.f32 %v1921_v39, %v1225_v44  ;;  %1847 = vmatmul.msk.f32.vlgmr.msra.gmra.mxu2 %vm845_vm2, %v1267_v22 }
 0x340   :  { %v1227_v48 = vadd.f32 %v1921_v39, %v1226_v46 }
 0x342   :  { %v1231_v14 = vsel %vm1230_vm11, %v1921_v39, %v1227_v48 }
 0x343   :  { %v1236_v50 = vsel %vm1233_vm12, %v1235_v49, %v1231_v14 }
 0x344   :  { %v1237_v51 = vmul.f32 %v2431_v38, %v1236_v50 }
 0x346   :  { %1845 = vmatmul.msk.f32.vlgmr.msrb.gmra.mxu0 %vm845_vm2, %v1237_v51 }
 0x3a7   :  { %v1334_v52 = vpop.f32.mrf.mxu1 }
 0x3a8   :  { %v1452_v53 = vrot.slane %v1334_v52, 4 }
 0x3ab   :  { %v1288_v27 = vpop.f32.mrf.mxu3 }
 0x3ac   :  { %v1453_v54 = vsel %vm129_vm1, %v1452_v53, %v1288_v27  ;;  %v1454_v55 = vrot.slane %v1288_v27, 4 }
 0x3ad   :  { %v1311_v47 = vpop.f32.mrf.mxu0  ;;  %v1459_v58 = vperm.slane %v1453_v54, %v2131_v16 }
 0x3ae   :  { %v1455_v56 = vsel %vm129_vm1, %v1334_v52, %v1454_v55  ;;  %v1466_v57 = vrot.slane %v1311_v47, 4 }
 0x3af   :  { %v1463_v59 = vperm.slane %v1455_v56, %v2131_v16  ;;  %v1478_v61 = vrot.slane %v1459_v58, 4 }
 0x3b1   :  { %v1490_v4 = vrot.slane %v1463_v59, 4 }
 0x3b4   :  { %v1357_v63 = vpop.f32.mrf.mxu2 }
 0x3b5   :  { %v1464_v60 = vrot.slane %v1357_v63, 4  ;;  %v1467_v38 = vsel %vm129_vm1, %v1357_v63, %v1466_v57  ;;  %v1426_v8 = vpop.f32.mrf.mxu1 }
 0x3b6   :  { %v1475_v15 = vperm.slane %v1467_v38, %v2131_v16  ;;  %v1508_v11 = vrot.slane %v1426_v8, 4 }
 0x3b7   :  { %v1465_v31 = vsel %vm129_vm1, %v1464_v60, %v1311_v47 }
 0x3b8   :  { %v1471_v7 = vperm.slane %v1465_v31, %v2131_v16  ;;  %v1488_v36 = vrot.slane %v1475_v15, 4  ;;  %v1491_v19 = vsel %vm129_vm1, %v1475_v15, %v1490_v4 }
 0x3b9   :  { %v1499_v62 = vperm.slane %v1491_v19, %v2153_v33 }
 0x3ba   :  { %v1476_v9 = vrot.slane %v1471_v7, 4  ;;  %v1479_v0 = vsel %vm129_vm1, %v1471_v7, %v1478_v61  ;;  %v1489_v1 = vsel %vm129_vm1, %v1488_v36, %v1463_v59 }
 0x3bb   :  { %v1487_v2 = vperm.slane %v1479_v0, %v2153_v33  ;;  %v1495_v3 = vperm.slane %v1489_v1, %v2153_v33  ;;  %v1506_v10 = vrot.slane %v1499_v62, 4 }
 0x3bc   :  { %v1477_v32 = vsel %vm129_vm1, %v1476_v9, %v1459_v58  ;;  %v1380_v5 = vpop.f32.mrf.mxu3 }
 0x3bd   :  { %v1483_v13 = vperm.slane %v1477_v32, %v2153_v33  ;;  %v1502_v28 = vrot.slane %v1487_v2, 4  ;;  %v1504_v29 = vrot.slane %v1495_v3, 4  ;;  %v1507_v30 = vsel %vm129_vm1, 0.0, %v1506_v10 }
 0x3be   :  { %v1575_v17 = vsel %vm129_vm1, %v1506_v10, %v1495_v3  ;;  %v1580_v18 = vrot.slane %v1507_v30, 4  ;;  %v1509_v20 = vsel %vm129_vm1, %v1508_v11, %v1380_v5  ;;  %v1510_v21 = vrot.slane %v1380_v5, 4 }
 0x3bf   :  { %v1500_v25 = vrot.slane %v1483_v13, 4  ;;  %v1503_v23 = vsel %vm129_vm1, 0.0, %v1502_v28  ;;  %v1505_v26 = vsel %vm129_vm1, 0.0, %v1504_v29  ;;  %v1579_v34 = vperm.slane %v1575_v17, %v2131_v16 }
 0x3c0   :  { %v1569_v6 = vrot.slane %v1503_v23, 4  ;;  %v1511_v35 = vsel %vm129_vm1, %v1426_v8, %v1510_v21  ;;  %v1515_v37 = vperm.slane %v1509_v20, %v2131_v16  ;;  %v1564_v39 = vsel %vm129_vm1, %v1502_v28, %v1483_v13 }
 0x3c1   :  { %v1501_v40 = vsel %vm129_vm1, 0.0, %v1500_v25  ;;  %v1568_v41 = vperm.slane %v1564_v39, %v2131_v16  ;;  %v1581_v42 = vsel %vm129_vm1, %v1580_v18, %v1505_v26  ;;  %v1449_v43 = vpop.f32.mrf.mxu2  ;;  %v1600_v45 = vrot.slane %v1579_v34, 4 }
 0x3c2   :  { %v1570_v44 = vsel %vm129_vm1, %v1569_v6, %v1501_v40  ;;  %v1585_v22 = vperm.slane %v1581_v42, %v2131_v16  ;;  %v1519_v46 = vperm.slane %v1511_v35, %v2131_v16  ;;  %v1520_v24 = vrot.slane %v1449_v43, 4 }
 0x3c3   :  { %v1574_v48 = vperm.slane %v1570_v44, %v2131_v16  ;;  %v1588_v49 = vrot.slane %v1568_v41, 4  ;;  %v1534_v14 = vrot.slane %v1515_v37, 4  ;;  %v1403_v50 = vpop.f32.mrf.mxu0 }
 0x3c4   :  { %v1601_v51 = vsel %vm129_vm1, %v1585_v22, %v1600_v45  ;;  %v1598_v52 = vrot.slane %v1585_v22, 4  ;;  %v1521_v53 = vsel %vm129_vm1, %v1520_v24, %v1403_v50  ;;  %v1522_v27 = vrot.slane %v1403_v50, 4 }
 0x3c5   :  { %v1589_v47 = vsel %vm129_vm1, %v1574_v48, %v1588_v49  ;;  %v1609_v54 = vperm.slane %v1601_v51, %v2153_v33  ;;  %v1527_v55 = vperm.slane %v1521_v53, %v2131_v16  ;;  %v1586_v57 = vrot.slane %v1574_v48, 4 }
 0x3c6   :  { %v1597_v56 = vperm.slane %v1589_v47, %v2153_v33  ;;  %v1599_v58 = vsel %vm129_vm1, %v1598_v52, %v1579_v34  ;;  %v1546_v59 = vrot.slane %v1519_v46, 4  ;;  %v1523_v63 = vsel %vm129_vm1, %v1449_v43, %v1522_v27 }
 0x3c7   :  { %v1614_v60 = vrot.slane %v1609_v54, 4  ;;  %v1605_v38 = vperm.slane %v1599_v58, %v2153_v33  ;;  %v1531_v4 = vperm.slane %v1523_v63, %v2131_v16  ;;  %v1532_v15 = vrot.slane %v1527_v55, 4  ;;  %v1706_v63 = vld [vmem:[#allocation7 + $0x10] sm:$0xff] }
 0x3c8   :  { %v1535_v31 = vsel %vm129_vm1, %v1527_v55, %v1534_v14  ;;  %v1616_v61 = vrot.slane %v1597_v56, 4  ;;  %v1587_v19 = vsel %vm129_vm1, %v1586_v57, %v1568_v41 }
 0x3c9   :  { %v1543_v7 = vperm.slane %v1535_v31, %v2153_v33  ;;  %v1615_v36 = vsel %vm129_vm1, %v1614_v60, %v1597_v56  ;;  %v1610_v62 = vrot.slane %v1605_v38, 4  ;;  %v1533_v8 = vsel %vm129_vm1, %v1532_v15, %v1515_v37  ;;  %v1704_v60 = vld [vmem:[#allocation7] sm:$0xff] }
 0x3ca   :  { %v1544_v9 = vrot.slane %v1531_v4, 4  ;;  %v1547_v0 = vsel %vm129_vm1, %v1531_v4, %v1546_v59  ;;  %1682 = vrot.lane.b32.xlu1 %v1615_v36, %s2039_s23  ;;  %v1617_v1 = vsel %vm129_vm1, %v1609_v54, %v1616_v61  ;;  %v1539_v2 = vperm.slane %v1533_v8, %v2153_v33  ;;  %v1707_v59 = vld [vmem:[#allocation7 + $0x18] sm:$0xff] }
 0x3cb   :  { %v1555_v3 = vperm.slane %v1547_v0, %v2153_v33  ;;  %v1558_v10 = vrot.slane %v1543_v7, 4  ;;  %1690 = vrot.lane.b32.xlu2 %v1617_v1, %s2040_s24  ;;  %v1593_v32 = vperm.slane %v1587_v19, %v2153_v33  ;;  %1726 = vmatpush.msrb.mxu3 %v1707_v59  ;;  %v1737_v4 = vld [vmem:[%s2682_s2] sm:$0xff] }
 0x3cc   :  { %v1545_v11 = vsel %vm129_vm1, %v1544_v9, %v1519_v46  ;;  %v1556_v13 = vrot.slane %v1539_v2, 4 }
 0x3cd   :  { %v1551_v5 = vperm.slane %v1545_v11, %v2153_v33  ;;  %v1559_v28 = vsel %vm129_vm1, 0.0, %v1558_v10  ;;  %v1562_v29 = vrot.slane %v1555_v3, 4  ;;  %v1618_v30 = vsel %vm129_vm1, %v1558_v10, %v1539_v2  ;;  %1727 = vmatpush.msrb.mxu3 %v1706_v63 }
 0x3ce   :  { %v1623_v17 = vrot.slane %v1559_v28, 4  ;;  %v1612_v18 = vrot.slane %v1593_v32, 4  ;;  %v1611_v20 = vsel %vm129_vm1, %v1610_v62, %v1593_v32  ;;  %v1557_v21 = vsel %vm129_vm1, 0.0, %v1556_v13 }
 0x3cf   :  { %v1560_v25 = vrot.slane %v1551_v5, 4  ;;  %v1563_v23 = vsel %vm129_vm1, 0.0, %v1562_v29  ;;  %v1622_v26 = vperm.slane %v1618_v30, %v2131_v16  ;;  %v1629_v37 = vsel %vm129_vm1, %v1562_v29, %v1551_v5 }
 0x3d0   :  { %v1634_v34 = vrot.slane %v1563_v23, 4  ;;  %v1613_v6 = vsel %vm129_vm1, %v1605_v38, %v1612_v18  ;;  %v1624_v35 = vsel %vm129_vm1, %v1623_v17, %v1557_v21  ;;  %v1633_v41 = vperm.slane %v1629_v37, %v2131_v16  ;;  %v1738_v38 = vld [vmem:[%s2682_s2 + $0x8] sm:$0xff] }
 0x3d1   :  { %1674 = vrot.lane.b32.xlu0 %v1613_v6, %s2028_s10  ;;  %v1561_v39 = vsel %vm129_vm1, 0.0, %v1560_v25  ;;  %v1628_v40 = vperm.slane %v1624_v35, %v2131_v16  ;;  %v1642_v42 = vrot.slane %v1622_v26, 4  ;;  %vm1740_vm13 = vcmp.eq.f32.partialorder %v1738_v38, 1.0 }
 0x3d2   :  { %v1635_v43 = vsel %vm129_vm1, %v1634_v34, %v1561_v39  ;;  %v1654_v45 = vrot.slane %v1633_v41, 4  ;;  %v1742_v15 = vsel %vm1740_vm13, 1, %v2038_v12 }
 0x3d3   :  { %v1639_v44 = vperm.slane %v1635_v43, %v2131_v16  ;;  %v1643_v22 = vsel %vm129_vm1, %v1628_v40, %v1642_v42  ;;  %v1640_v46 = vrot.slane %v1628_v40, 4 }
 0x3d4   :  { %v1651_v24 = vperm.slane %v1643_v22, %v2153_v33 }
 0x3d5   :  { %v1655_v48 = vsel %vm129_vm1, %v1639_v44, %v1654_v45  ;;  %v1641_v49 = vsel %vm129_vm1, %v1640_v46, %v1622_v26  ;;  %v1652_v14 = vrot.slane %v1639_v44, 4 }
 0x3d6   :  { %v1663_v50 = vperm.slane %v1655_v48, %v2153_v33  ;;  %v1670_v51 = vrot.slane %v1651_v24, 4  ;;  %v1647_v52 = vperm.slane %v1641_v49, %v2153_v33 }
 0x3d7   :  { %v1653_v53 = vsel %vm129_vm1, %v1652_v14, %v1633_v41 }
 0x3d8   :  { %v1671_v16 = vsel %vm129_vm1, %v1663_v50, %v1670_v51  ;;  %v1659_v27 = vperm.slane %v1653_v53, %v2153_v33  ;;  %v1666_v47 = vrot.slane %v1647_v52, 4  ;;  %v1668_v57 = vrot.slane %v1663_v50, 4  ;;  %v1705_v33 = vld [vmem:[#allocation7 + $0x8] sm:$0xff]  ;;  %v1888_v51 = vld [vmem:[%s2685_s5] ss:$0 sm:$0xff] }
 0x3d9   :  { %1692 = vrot.lane.b32.xlu1 %v1671_v16, %s2040_s24  ;;  %1728 = vmatpush.msrb.mxu3 %v1705_v33 }
 0x3da   :  { %v1664_v54 = vrot.slane %v1659_v27, 4  ;;  %v1667_v55 = vsel %vm129_vm1, %v1659_v27, %v1666_v47  ;;  %v1669_v58 = vsel %vm129_vm1, %v1668_v57, %v1651_v24  ;;  %v1889_v27 = vld [vmem:[%s2686_s6] ss:$0 sm:$0xff] }
 0x3db   :  { %1676 = vrot.lane.b32.xlu0 %v1667_v55, %s2028_s10  ;;  %1729 = vmatpush.msrb.mxu3 %v1704_v60 }
 0x3dc   :  { %v1665_v56 = vsel %vm129_vm1, %v1664_v54, %v1647_v52  ;;  %vm1739_vm1 = vcmp.eq.f32.partialorder %v1737_v4, 1.0 }
 0x3dd   :  { %v1741_v31 = vsel %vm1739_vm1, 1, %v2038_v12 }
 0x3de   :  { %1744 = vperm.xlu2 %1886, %v1741_v31  }
 0x3e3   :  { %1684 = vrot.lane.b32.xlu0 %v1669_v58, %s2039_s23 }
 0x3eb   :  { %1747 = vperm.xlu0 %1887, %v1742_v15  }
 0x425   :  { %v1691_v19 = vpop.permute.xlu2 %1690 }
 0x438   :  { %v1745_v32 = vpop.permute.xlu2 %1744 }
 0x439   :  { %vm1749_vm3 = vcmp.eq.s32.totalorder %v1745_v32, 1 }
 0x43c   :  { %v1683_v7 = vpop.permute.xlu1 %1682 }
 0x443   :  { %v1675_v61 = vpop.permute.xlu0 %1674 }
 0x444   :  { %v1696_v36 = vsel %vm845_vm2, %v1611_v20, %v1675_v61 }
 0x445   :  { %v1699_v62 = vsel %vm1698_vm14, %v1696_v36, %v1683_v7 }
 0x446   :  { %v1702_v8 = vsel %vm1701_vm15, %v1699_v62, %v1691_v19 }
 0x447   :  { %1848 = vmatmul.msk.f32.vlgmr.msrb.gmra.mxu3 %vm78_vm0, %v1702_v8 }
 0x44b   :  { %v1693_v2 = vpop.permute.xlu1 %1692 }
 0x44d   :  { %v1677_v9 = vpop.permute.xlu0 %1676 }
 0x44e   :  { %v1697_v0 = vsel %vm845_vm2, %v1665_v56, %v1677_v9 }
 0x455   :  { %v1685_v1 = vpop.permute.xlu0 %1684 }
 0x456   :  { %v1700_v3 = vsel %vm1698_vm14, %v1697_v0, %v1685_v1 }
 0x457   :  { %v1703_v12 = vsel %vm1701_vm15, %v1700_v3, %v1693_v2 }
 0x458   :  { %1849 = vmatmul.msk.f32.gmra.mxu3 %vm78_vm0, %v1703_v12 }
 0x45d   :  { %v1748_v11 = vpop.permute.xlu0 %1747 }
 0x45e   :  { %vm1750_vm4 = vcmp.eq.s32.totalorder %v1748_v11, 1 }
 0x4ca   :  { %v1731_v10 = vpop.f32.mrf.mxu3 }
 0x4cb   :  { %v1751_v13 = vsel %vm1749_vm3, %v1731_v10, 0.0 }
 0x4db   :  { %v1734_v5 = vpop.f32.mrf.mxu3 }
 0x4dc   :  { %v1752_v28 = vsel %vm1750_vm4, %v1734_v5, 0.0 }
 0x4dd   :  { %v1753_v29 = vadd.f32 %v1752_v28, %v1751_v13 }
 0x4df   :  { %v1754_v30 = vrot.slane %v1753_v29, 4 }
 0x4e1   :  { %v1755_v17 = vadd.f32 %v1754_v30, %v1753_v29 }
 0x4e3   :  { %v1756_v18 = vrot.slane %v1755_v17, 2 }
 0x4e5   :  { %v1757_v20 = vadd.f32 %v1756_v18, %v1755_v17 }
 0x4e7   :  { %v1758_v21 = vrot.slane %v1757_v20, 1 }
 0x4e9   :  { %v1759_v25 = vadd.f32 %v1758_v21, %v1757_v20 }
 0x4eb   :  { %v1760_v23 = vmul.f32 0.0625, %v1759_v25 }
 0x4ed   :  { %v1761_v26 = vsub.f32 %v1751_v13, %v1760_v23  ;;  %v1762_v34 = vsub.f32 %v1752_v28, %v1760_v23 }
 0x4ef   :  { %v1763_v6 = vmul.f32 %v1761_v26, %v1761_v26  ;;  %v1764_v35 = vmul.f32 %v1762_v34, %v1762_v34 }
 0x4f1   :  { %v1765_v37 = vadd.f32 %v1764_v35, %v1763_v6 }
 0x4f3   :  { %v1766_v39 = vrot.slane %v1765_v37, 4 }
 0x4f5   :  { %v1767_v40 = vadd.f32 %v1766_v39, %v1765_v37 }
 0x4f7   :  { %v1768_v41 = vrot.slane %v1767_v40, 2 }
 0x4f9   :  { %v1769_v42 = vadd.f32 %v1768_v41, %v1767_v40 }
 0x4fb   :  { %v1770_v43 = vrot.slane %v1769_v42, 1 }
 0x4fd   :  { %v1771_v44 = vadd.f32 %v1770_v43, %v1769_v42 }
 0x4ff   :  { %v1772_v22 = vmul.f32 0.0625, %v1771_v44 }
 0x501   :  { %v1773_v45 = vadd.f32 1e-05, %v1772_v22 }
 0x503   :  { %1922 = vrsqrt.f32 %v1773_v45  ;;  %vm1780_vm2 = vweird.f32 %v1773_v45 }
 0x509   :  { %v1923_v46 = vpop.eup %1922 }
 0x50a   :  { %v1775_v24 = vmul.f32 %v1923_v46, %v1773_v45  ;;  %vm1781_vm0 = vweird.f32 %v1923_v46 }
 0x50b   :  { %vm1782_vm5 = vmor %vm1780_vm2, %vm1781_vm0 }
 0x50c   :  { %v1776_v48 = vmul.f32 %v1923_v46, %v1775_v24 }
 0x50e   :  { %v1777_v49 = vmul.f32 0.5, %v1776_v48 }
 0x510   :  { %v1778_v14 = vsub.f32 1.5, %v1777_v49 }
 0x512   :  { %v1779_v50 = vmul.f32 %v1923_v46, %v1778_v14 }
 0x514   :  { %v1783_v52 = vsel %vm1782_vm5, %v1923_v46, %v1779_v50 }
 0x515   :  { %v1784_v53 = vmul.f32 %v1783_v52, %v1761_v26  ;;  %v1785_v16 = vmul.f32 %v1783_v52, %v1762_v34 }
 0x517   :  { %v1790_v47 = vmul.f32 %v1888_v51, %v1784_v53  ;;  %v1791_v54 = vmul.f32 %v1888_v51, %v1785_v16 }
 0x519   :  { %v1797_v55 = vadd.f32 %v1889_v27, %v1791_v54  ;;  %v1796_v56 = vadd.f32 %v1889_v27, %v1790_v47 }
 0x51b   :  { %v1798_v57 = vsel %vm1749_vm3, %v1796_v56, 0.0  ;;  %v1799_v58 = vsel %vm1750_vm4, %v1797_v55, 0.0 }
 0x51c   :  { %1800 = vst [vmem:[#allocation8] sm:$0xff] %v1798_v57 }
 0x51d   :  { %1801 = vst [vmem:[#allocation8 + $0x8] sm:$0xff] %v1799_v58 }
 0x51e   :  { %1814 = dma.vmem_to_hbm [thread:$0]  %s1807_s12, 256, %s1809_s14, [#allocation4], %s2027_s9, %s2027_s9, %s2028_s10  }
 0x51f   :  { %2024 = dma.done.wait [#allocation4], 256  }
 0x520   :  { %2025 = vsyncadd [#allocation4], 4294967040 }
 0x521   :  { %1819 = vsyncpa [#allocation3], 1 }
 0x522   :  { %1820 = vsyncpa [#allocation6], 1 }
 0x523   :  { %1821 = vsyncpa [#allocation4], 1 }

</bundles_post_ra>
